<compile_context>
chip_gen: v7x
topology: tpu7x:2x2x1
jax: 0.10.0
libtpu: 0.0.40
codegen_flags: <defaults>
</compile_context>

<pallas_src>
import functools
import math

import jax
import jax.numpy as jnp
from jax.experimental import pallas as pl
from jax.experimental.pallas import tpu as pltpu

_LANE = 128
_BF16_SUBLANE = 16        # bf16 packs two rows per sublane -> align M to 16

# Uniform tile budget (review: same on v5e/v6e/v7x; actual VMEM use is small
# and the per-step overhead is what dominates, so use big tiles everywhere).
_TM, _TN, _TK = 512, 256, 512


# ---------------------------------------------------------------------------
# Small helpers
# ---------------------------------------------------------------------------
def _round_up(x, m):
    return (x + m - 1) // m * m


def _split_dim(size, tile_max, align):
    """(tile, padded) with tile % align == 0, padded % tile == 0, tile<=tile_max."""
    padded = _round_up(max(size, align), align)
    if padded <= tile_max:
        return padded, padded
    n = -(-padded // tile_max)
    tile = _round_up(-(-padded // n), align)
    return tile, tile * n


def _pick_div(size, candidates):
    for c in candidates:
        if size % c == 0:
            return c
    return None


def _pad2(a, rows, cols):
    if rows or cols:
        return jnp.pad(a, ((0, rows), (0, cols)))
    return a


def _vmem_limit(block_bytes):
    """VMEM limit derived from actual block sizes (double-buffer + margin)."""
    need = 2 * int(block_bytes) + (8 << 20)
    return int(min(max(need, 24 << 20), 48 << 20))


# ---------------------------------------------------------------------------
# Fused dense matmul kernel (1x1x1 convs, conv3+residual, FC head)
# ---------------------------------------------------------------------------
def _fused_mm_kernel(*refs, relu, has_res):
    """acc += x @ w (bf16 -> f32); epilogue: *scale + bias [+ residual] [relu]."""
    if has_res:
        x_ref, w_ref, s_ref, b_ref, r_ref, o_ref, acc_ref = refs
    else:
        x_ref, w_ref, s_ref, b_ref, o_ref, acc_ref = refs
        r_ref = None

    @pl.when(pl.program_id(2) == 0)
    def _init():
        acc_ref[...] = jnp.zeros_like(acc_ref)

    acc_ref[...] += jnp.dot(x_ref[...], w_ref[...],
                            preferred_element_type=jnp.float32)

    @pl.when(pl.program_id(2) == pl.num_programs(2) - 1)
    def _epilogue():
        y = acc_ref[...] * s_ref[...] + b_ref[...]
        if has_res:
            y = y + r_ref[...].astype(jnp.float32)
        if relu:
            y = jnp.maximum(y, 0.0)
        o_ref[...] = y.astype(o_ref.dtype)


def fused_matmul(x, w, scale, bias, *, relu=False, residual=None,
                 out_dtype=jnp.float32):
    """y = act((x @ w) * scale + bias [+ residual]).

    bf16 MXU operands, f32 accumulation in a VMEM scratch.  Grid is
    (N, M, K) = ("parallel", "parallel", "arbitrary"); N leads so megacore
    still has parallel work when M is tiny (FC head).  scale/bias broadcast
    per output column (folded BatchNorm / Linear bias); `residual` fuses the
    bottleneck shortcut add into the epilogue.
    """
    M, K = x.shape
    K2, N = w.shape
    assert K == K2
    tm, Mp = _split_dim(M, _TM, _BF16_SUBLANE)
    tn, Np = _split_dim(N, _TN, _LANE)
    tk, Kp = _split_dim(K, _TK, _LANE)

    xb = _pad2(x.astype(jnp.bfloat16), Mp - M, Kp - K)
    wb = _pad2(w.astype(jnp.bfloat16), Kp - K, Np - N)
    s2 = _pad2(scale.astype(jnp.float32).reshape(1, N), 0, Np - N)
    b2 = _pad2(bias.astype(jnp.float32).reshape(1, N), 0, Np - N)

    in_specs = [
        pl.BlockSpec((tm, tk), lambda j, i, k: (i, k)),
        pl.BlockSpec((tk, tn), lambda j, i, k: (k, j)),
        pl.BlockSpec((1, tn), lambda j, i, k: (0, j)),
        pl.BlockSpec((1, tn), lambda j, i, k: (0, j)),
    ]
    args = [xb, wb, s2, b2]
    has_res = residual is not None
    blk = (tm * tk * 2 + tk * tn * 2 + 2 * tn * 4
           + tm * tn * (4 + jnp.dtype(out_dtype).itemsize))
    if has_res:
        rb = _pad2(residual.astype(jnp.bfloat16), Mp - M, Np - N)
        in_specs.append(pl.BlockSpec((tm, tn), lambda j, i, k: (i, j)))
        args.append(rb)
        blk += tm * tn * 2

    out = pl.pallas_call(
        functools.partial(_fused_mm_kernel, relu=relu, has_res=has_res),
        out_shape=jax.ShapeDtypeStruct((Mp, Np), out_dtype),
        grid_spec=pltpu.PrefetchScalarGridSpec(
            num_scalar_prefetch=0,
            grid=(Np // tn, Mp // tm, Kp // tk),
            in_specs=in_specs,
            out_specs=pl.BlockSpec((tm, tn), lambda j, i, k: (i, j)),
            scratch_shapes=[pltpu.VMEM((tm, tn), jnp.float32)]),
        compiler_params=pltpu.CompilerParams(
            dimension_semantics=("parallel", "parallel", "arbitrary"),
            vmem_limit_bytes=_vmem_limit(blk)),
    )(*args)
    if Mp != M or Np != N:
        out = out[:M, :N]
    return out


# ---------------------------------------------------------------------------
# Direct (im2col-free) 3-D convolution kernel
# ---------------------------------------------------------------------------
def _direct_conv_kernel(x_ref, w_ref, s_ref, b_ref, o_ref, acc_ref, *,
                        starts, ho, wo, relu):
    od = pl.program_id(3)
    kk = pl.program_id(4)

    @pl.when((od == 0) & (kk == 0))
    def _init():
        acc_ref[...] = jnp.zeros_like(acc_ref)

    # x_ref block: (1, 1, Hp, Wp, tk) -- one (reordered) padded depth plane.
    # w_ref block: (1, kh*kw, tk, tn) -- all in-plane taps for this depth tap.
    for j, (hs, ws) in enumerate(starts):
        win = x_ref[0, 0, pl.ds(hs, ho), pl.ds(ws, wo), :]
        acc_ref[...] += jnp.dot(win.reshape(ho * wo, win.shape[-1]),
                                w_ref[0, j],
                                preferred_element_type=jnp.float32)

    @pl.when((od == pl.num_programs(3) - 1) & (kk == pl.num_programs(4) - 1))
    def _fin():
        y = acc_ref[...] * s_ref[...] + b_ref[...]
        if relu:
            y = jnp.maximum(y, 0.0)
        o_ref[0, 0] = y.reshape(ho, wo, -1).astype(o_ref.dtype)


def conv3d_direct(x, w5, scale, bias, *, ksize, stride, padding, relu=True,
                  n_chunks=1, out_dtype=jnp.bfloat16):
    """Direct Conv3d + folded BatchNorm (+ ReLU), channels-last, no im2col.

    The kernel depth-offset is an 'arbitrary' grid axis (one input depth plane
    DMA'd per step); kh*kw offsets are an unrolled in-kernel loop of matmuls
    accumulating into a f32 VMEM scratch.  Stride-2 spatial axes are
    pre-regrouped into [even | odd] halves so in-kernel reads stay contiguous.

    w5: (kd, kh*kw, K_rows, N_cols).  n_chunks > 1 marks a grouped conv whose
    weight holds per-chunk (128-lane) diagonal blocks stacked along K_rows;
    the chunk index then doubles as both the K and the N block index, skipping
    the all-zero cross-group blocks.
    """
    B, D, H, W, C = x.shape
    kd, kh, kw = ksize
    sd, sh, sw = stride
    pd, ph, pw = padding
    khw = kh * kw
    assert w5.shape[0] == kd and w5.shape[1] == khw and w5.shape[2] == C

    Do = (D + 2 * pd - kd) // sd + 1
    Ho = (H + 2 * ph - kh) // sh + 1
    Wo = (W + 2 * pw - kw) // sw + 1

    xp = x.astype(jnp.bfloat16)
    if pd or ph or pw:
        xp = jnp.pad(xp, ((0, 0), (pd, pd), (ph, ph), (pw, pw), (0, 0)))
    Hp, Wp = H + 2 * ph, W + 2 * pw
    if sh == 2:
        if Hp % 2:
            xp = jnp.pad(xp, ((0, 0), (0, 0), (0, 1), (0, 0), (0, 0)))
            Hp += 1
        xp = jnp.concatenate([xp[:, :, 0::2], xp[:, :, 1::2]], axis=2)
    if sw == 2:
        if Wp % 2:
            xp = jnp.pad(xp, ((0, 0), (0, 0), (0, 0), (0, 1), (0, 0)))
            Wp += 1
        xp = jnp.concatenate([xp[:, :, :, 0::2], xp[:, :, :, 1::2]], axis=3)

    def _start(o, s, full):
        return o if s == 1 else (o % 2) * (full // 2) + o // 2

    starts = [(_start(j // kw, sh, Hp), _start(j % kw, sw, Wp))
              for j in range(khw)]

    nw = w5.shape[3]
    if n_chunks > 1:
        tn_c, tk_c = nw, C // n_chunks
        n_tiles, k_tiles = n_chunks, 1
        cout = nw * n_chunks
        x_map = lambda b, do, n, od, k: (b, do * sd + od, 0, 0, n)
        w_map = lambda b, do, n, od, k: (od, 0, n, 0)
    else:
        tk_c = _pick_div(C, (512, 384, 256, 128)) or C
        tn_c = _pick_div(nw, (256, 128)) or nw
        n_tiles, k_tiles = nw // tn_c, C // tk_c
        cout = nw
        x_map = lambda b, do, n, od, k: (b, do * sd + od, 0, 0, k)
        w_map = lambda b, do, n, od, k: (od, 0, k, n)
    sb_map = lambda b, do, n, od, k: (0, n)
    o_map = lambda b, do, n, od, k: (b, do, 0, 0, n)

    s2 = scale.astype(jnp.float32).reshape(1, cout)
    b2 = bias.astype(jnp.float32).reshape(1, cout)

    blk = (Hp * Wp * tk_c * 2 + khw * tk_c * tn_c * 2 + 2 * tn_c * 4
           + Ho * Wo * tn_c * (4 + jnp.dtype(out_dtype).itemsize))

    out = pl.pallas_call(
        functools.partial(_direct_conv_kernel, starts=starts, ho=Ho, wo=Wo,
                          relu=relu),
        out_shape=jax.ShapeDtypeStruct((B, Do, Ho, Wo, cout), out_dtype),
        grid_spec=pltpu.PrefetchScalarGridSpec(
            num_scalar_prefetch=0,
            grid=(B, Do, n_tiles, kd, k_tiles),
            in_specs=[
                pl.BlockSpec((1, 1, Hp, Wp, tk_c), x_map),
                pl.BlockSpec((1, khw, tk_c, tn_c), w_map),
                pl.BlockSpec((1, tn_c), sb_map),
                pl.BlockSpec((1, tn_c), sb_map),
            ],
            out_specs=pl.BlockSpec((1, 1, Ho, Wo, tn_c), o_map),
            scratch_shapes=[pltpu.VMEM((Ho * Wo, tn_c), jnp.float32)]),
        compiler_params=pltpu.CompilerParams(
            dimension_semantics=("parallel", "parallel", "parallel",
                                 "arbitrary", "arbitrary"),
            vmem_limit_bytes=_vmem_limit(blk)),
    )(xp, w5, s2, b2)
    return out


# ---------------------------------------------------------------------------
# Fused MaxPool3d(3, 2, 1) kernel
# ---------------------------------------------------------------------------
def _maxpool3d_kernel(x0_ref, x1_ref, x2_ref, o_ref, *, starts, ho, wo):
    acc = None
    for r in (x0_ref, x1_ref, x2_ref):
        for hs, ws in starts:
            win = r[0, 0, pl.ds(hs, ho), pl.ds(ws, wo), :]
            acc = win if acc is None else jnp.maximum(acc, win)
    o_ref[0, 0] = acc


def maxpool3d_cl(x):
    """MaxPool3d(kernel=3, stride=2, padding=1), channels-last.

    Single fused kernel: the -inf padded, even/odd-regrouped tensor is read
    once per output depth (three depth-plane operands) and the 27-tap
    stride-2 max is computed in VMEM -- no strided HBM window copies and no
    per-axis passes."""
    B, D, H, W, C = x.shape
    Do = (D - 1) // 2 + 1
    Ho = (H - 1) // 2 + 1
    Wo = (W - 1) // 2 + 1
    neg = jnp.asarray(-jnp.inf, x.dtype)
    xp = jnp.pad(x, ((0, 0), (1, 1), (1, 1), (1, 1), (0, 0)),
                 constant_values=neg)
    Hp, Wp = H + 2, W + 2
    if Hp % 2:
        xp = jnp.pad(xp, ((0, 0), (0, 0), (0, 1), (0, 0), (0, 0)),
                     constant_values=neg)
        Hp += 1
    if Wp % 2:
        xp = jnp.pad(xp, ((0, 0), (0, 0), (0, 0), (0, 1), (0, 0)),
                     constant_values=neg)
        Wp += 1
    xp = jnp.concatenate([xp[:, :, 0::2], xp[:, :, 1::2]], axis=2)
    xp = jnp.concatenate([xp[:, :, :, 0::2], xp[:, :, :, 1::2]], axis=3)

    def _st(o, full):
        return (o % 2) * (full // 2) + o // 2

    starts = [(_st(j // 3, Hp), _st(j % 3, Wp)) for j in range(9)]

    def in_spec(od):
        return pl.BlockSpec((1, 1, Hp, Wp, C),
                            lambda b, do, od=od: (b, 2 * do + od, 0, 0, 0))

    itm = x.dtype.itemsize
    blk = 3 * Hp * Wp * C * itm + Ho * Wo * C * itm
    out = pl.pallas_call(
        functools.partial(_maxpool3d_kernel, starts=starts, ho=Ho, wo=Wo),
        out_shape=jax.ShapeDtypeStruct((B, Do, Ho, Wo, C), x.dtype),
        grid_spec=pltpu.PrefetchScalarGridSpec(
            num_scalar_prefetch=0, grid=(B, Do),
            in_specs=[in_spec(0), in_spec(1), in_spec(2)],
            out_specs=pl.BlockSpec((1, 1, Ho, Wo, C),
                                   lambda b, do: (b, do, 0, 0, 0))),
        compiler_params=pltpu.CompilerParams(
            dimension_semantics=("parallel", "parallel"),
            vmem_limit_bytes=_vmem_limit(blk)),
    )(xp, xp, xp)
    return out


# ---------------------------------------------------------------------------
# Global average pool (channels in lanes)
# ---------------------------------------------------------------------------
def _avgpool_kernel(x_ref, o_ref):
    x = x_ref[...].astype(jnp.float32)            # (1, S, C)
    o_ref[...] = jnp.sum(x, axis=1, keepdims=True) * (1.0 / x.shape[1])


def avgpool_cl(x):
    B, D, H, W, C = x.shape
    S = D * H * W
    x3 = x.reshape(B, S, C)
    blk = S * C * x3.dtype.itemsize + C * 4
    out = pl.pallas_call(
        _avgpool_kernel,
        out_shape=jax.ShapeDtypeStruct((B, 1, C), jnp.float32),
        grid=(B,),
        in_specs=[pl.BlockSpec((1, S, C), lambda b: (b, 0, 0))],
        out_specs=pl.BlockSpec((1, 1, C), lambda b: (b, 0, 0)),
        compiler_params=pltpu.CompilerParams(
            dimension_semantics=("parallel",),
            vmem_limit_bytes=_vmem_limit(blk)),
    )(x3)
    return out.reshape(B, C)


# ---------------------------------------------------------------------------
# BN folding and weight layout preparation
# ---------------------------------------------------------------------------
def bn_fold(gamma, beta, mean, var, eps=1e-5):
    s = gamma / jnp.sqrt(var + eps)
    return s, beta - mean * s


def _pad_vec(v, cp):
    return jnp.pad(v.astype(jnp.float32), (0, cp - v.shape[0]))


def _fold_pad(bn, cp):
    s, b = bn_fold(**bn)
    return _pad_vec(s, cp), _pad_vec(b, cp)


def _pw_weight(w, cp_in, cp_out):
    """1x1x1 conv weight (Cout, Cin, 1,1,1) -> padded (Cp_in, Cp_out)."""
    cout, cin = w.shape[0], w.shape[1]
    m = jnp.zeros((cp_in, cp_out), jnp.float32)
    m = m.at[:cin, :cout].set(w.reshape(cout, cin).T)
    return m.astype(jnp.bfloat16)


def _dense_direct_weight(w, cp_out):
    """Dense conv weight (Cout, Cin, kd, kh, kw) -> (kd, kh*kw, Cin, Cp_out)."""
    cout, cin, kd, kh, kw = w.shape
    m = jnp.transpose(w, (2, 3, 4, 1, 0)).reshape(kd, kh * kw, cin, cout)
    m = jnp.pad(m, ((0, 0), (0, 0), (0, 0), (0, cp_out - cout)))
    return m.astype(jnp.bfloat16)


def _grouped_direct_weight(w, groups, cp):
    """Grouped 3x3x3 conv weight -> direct-conv matmul weights.

    When the channel width allows, groups are packed into 128-lane chunks
    (the chunk becomes a grid axis that indexes both K and N), skipping the
    all-zero cross-group blocks.
    # TODO(synk): within a 128-lane chunk the weight is still block-diagonal
    # (waste factor 128/group_width); going finer than 128 lanes would break
    # the (8,128) lane-density constraint on the output blocks.
    """
    mid, gin = int(w.shape[0]), int(w.shape[1])
    gout = mid // groups
    kd, kh, kw = int(w.shape[2]), int(w.shape[3]), int(w.shape[4])
    khw = kh * kw
    wt = jnp.transpose(w, (2, 3, 4, 1, 0)).reshape(kd, khw, gin, mid)
    full = jnp.zeros((kd, khw, cp, cp), jnp.float32)
    for g in range(groups):
        full = full.at[:, :, g * gin:(g + 1) * gin,
                       g * gout:(g + 1) * gout].set(
            wt[:, :, :, g * gout:(g + 1) * gout])
    if (cp % _LANE == 0 and mid % _LANE == 0
            and _LANE % gout == 0 and _LANE % gin == 0):
        n_chunks = cp // _LANE
    else:
        n_chunks = 1
    if n_chunks > 1:
        chunks = [full[:, :, c * _LANE:(c + 1) * _LANE,
                       c * _LANE:(c + 1) * _LANE] for c in range(n_chunks)]
        w5 = jnp.concatenate(chunks, axis=2)            # (kd, khw, cp, 128)
    else:
        w5 = full                                       # (kd, khw, cp, cp)
    return w5.astype(jnp.bfloat16), n_chunks


# ---------------------------------------------------------------------------
# Model definition (scaled-down ResNeXt3D + FC head)
# ---------------------------------------------------------------------------
CARDINALITY = 4
STEM = 4
PLANES = (8, 16, 32, 64)
BLOCKS = (2, 1, 1, 1)
STRIDES = (1, 2, 2, 2)
EXPANSION = 2


def init_params(key, embed_size):
    keys = iter(jax.random.split(key, 256))

    def nrm(shape, scale):
        return jax.random.normal(next(keys), shape, jnp.float32) * scale

    def conv_w(cout, cin, k):
        fan = cin * k[0] * k[1] * k[2]
        return nrm((cout, cin) + k, 1.0 / math.sqrt(fan))

    def bn_p(c):
        return dict(gamma=1.0 + 0.1 * nrm((c,), 1.0),
                    beta=0.1 * nrm((c,), 1.0),
                    mean=jnp.zeros((c,), jnp.float32),
                    var=jnp.ones((c,), jnp.float32))

    def lin(cout, cin):
        s = 1.0 / math.sqrt(cin)
        return nrm((cout, cin), s), nrm((cout,), s)

    params = dict(conv1_w=conv_w(STEM, 3, (7, 7, 7)), bn1=bn_p(STEM))
    layers = []
    inplanes = STEM
    for planes, nblocks, stride in zip(PLANES, BLOCKS, STRIDES):
        mid = planes
        out = planes * EXPANSION
        blocks = []
        for b in range(nblocks):
            st = stride if b == 0 else 1
            blk = dict(
                stride=st,
                c1_w=conv_w(mid, inplanes, (1, 1, 1)), bn_a=bn_p(mid),
                c2_w=conv_w(mid, mid // CARDINALITY, (3, 3, 3)), bn_b=bn_p(mid),
                c3_w=conv_w(out, mid, (1, 1, 1)), bn_c=bn_p(out),
            )
            if st != 1 or inplanes != out:
                blk["down_w"] = conv_w(out, inplanes, (1, 1, 1))
                blk["bn_d"] = bn_p(out)
            blocks.append(blk)
            inplanes = out
        layers.append(blocks)
    params["layers"] = layers

    feat_dim = PLANES[-1] * EXPANSION
    params["fc6_w"], params["fc6_b"] = lin(feat_dim, feat_dim)
    params["fc7_w"], params["fc7_b"] = lin(feat_dim, feat_dim)
    params["fc8_w"], params["fc8_b"] = lin(embed_size, feat_dim)
    params["bn_feat"] = bn_p(embed_size)
    params["cls_w"], params["cls_b"] = lin(7, feat_dim)
    return params


def prepare_params(params):
    pp = {}
    cp_stem = _round_up(STEM, _LANE)
    s, b = bn_fold(**params["bn1"])
    # Stem keeps Cin=3 unpadded (lane dim == full array dim is legal); only
    # the output channels are lane-padded.
    pp["conv1"] = dict(w=_dense_direct_weight(params["conv1_w"], cp_stem),
                       s=_pad_vec(s, cp_stem), b=_pad_vec(b, cp_stem))
    blocks = []
    cp_in = cp_stem
    for layer in params["layers"]:
        for blk in layer:
            mid = blk["c1_w"].shape[0]
            out = blk["c3_w"].shape[0]
            cp_mid = _round_up(mid, _LANE)
            cp_out = _round_up(out, _LANE)
            pb = dict(stride=blk["stride"])
            pb["w1"] = _pw_weight(blk["c1_w"], cp_in, cp_mid)
            pb["s1"], pb["b1"] = _fold_pad(blk["bn_a"], cp_mid)
            pb["w2"], pb["n_chunks"] = _grouped_direct_weight(
                blk["c2_w"], CARDINALITY, cp_mid)
            pb["s2"], pb["b2"] = _fold_pad(blk["bn_b"], cp_mid)
            pb["w3"] = _pw_weight(blk["c3_w"], cp_mid, cp_out)
            pb["s3"], pb["b3"] = _fold_pad(blk["bn_c"], cp_out)
            if "down_w" in blk:
                pb["wd"] = _pw_weight(blk["down_w"], cp_in, cp_out)
                pb["sd"], pb["bd"] = _fold_pad(blk["bn_d"], cp_out)
            blocks.append(pb)
            cp_in = cp_out
    pp["blocks"] = blocks

    feat_dim = PLANES[-1] * EXPANSION
    embed = params["fc8_w"].shape[0]
    pp["feat_dim"] = feat_dim
    pp["embed_size"] = embed
    pp["fc6_w"], pp["fc6_b"] = params["fc6_w"].T, params["fc6_b"]
    pp["fc7_w"], pp["fc7_b"] = params["fc7_w"].T, params["fc7_b"]
    # fc8 (+ folded BatchNorm1d) and the classifier merged into ONE matmul.
    s_bn, b_bn = bn_fold(**params["bn_feat"])
    pp["w_head"] = jnp.concatenate([params["fc8_w"].T, params["cls_w"].T],
                                   axis=1)
    pp["s_head"] = jnp.concatenate([s_bn, jnp.ones((7,), jnp.float32)])
    pp["b_head"] = jnp.concatenate([params["fc8_b"] * s_bn + b_bn,
                                    params["cls_b"]])
    return pp


# ---------------------------------------------------------------------------
# Forward
# ---------------------------------------------------------------------------
def _pointwise(x, w, s, b, *, relu, residual=None, out_dtype=jnp.bfloat16):
    B, D, H, W, C = x.shape
    M = B * D * H * W
    res = None if residual is None else residual.reshape(M, -1)
    y = fused_matmul(x.reshape(M, C), w, s, b, relu=relu, residual=res,
                     out_dtype=out_dtype)
    return y.reshape(B, D, H, W, w.shape[1])


def bottleneck_cl(x, p):
    st = p["stride"]
    h = _pointwise(x, p["w1"], p["s1"], p["b1"], relu=True)
    h = conv3d_direct(h, p["w2"], p["s2"], p["b2"], ksize=(3, 3, 3),
                      stride=(st, st, st), padding=(1, 1, 1), relu=True,
                      n_chunks=p["n_chunks"])
    if "wd" in p:
        # TODO(synk): the stride-2 shortcut subsample is an XLA strided slice
        # (1/8-sized copy) rather than folded into the matmul BlockSpec;
        # folding it would require strided sublane reads we deliberately avoid.
        xs = x[:, ::st, ::st, ::st, :] if st != 1 else x
        sc = _pointwise(xs, p["wd"], p["sd"], p["bd"], relu=False)
    else:
        sc = x
    # conv3 + folded BN + residual add + ReLU fused in one matmul epilogue.
    return _pointwise(h, p["w3"], p["s3"], p["b3"], relu=True, residual=sc)


def encoder_resnext3d_forward(pp, x):
    """x: (B, 3, D, H, W) float32 (PyTorch NCDHW). Returns (feature, out_class)."""
    x = jnp.transpose(x, (0, 2, 3, 4, 1)).astype(jnp.bfloat16)   # channels-last
    c = pp["conv1"]
    x = conv3d_direct(x, c["w"], c["s"], c["b"], ksize=(7, 7, 7),
                      stride=(1, 2, 2), padding=(3, 3, 3), relu=True)
    x = maxpool3d_cl(x)
    for pb in pp["blocks"]:
        x = bottleneck_cl(x, pb)
    feat = avgpool_cl(x)[:, :pp["feat_dim"]]
    ones = jnp.ones((pp["feat_dim"],), jnp.float32)
    # TODO(synk): nn.Dropout(0.5) is stochastic; implemented as eval-mode identity.
    h = fused_matmul(feat, pp["fc6_w"], ones, pp["fc6_b"], relu=True)
    h = fused_matmul(h, pp["fc7_w"], ones, pp["fc7_b"], relu=True)
    out = fused_matmul(h, pp["w_head"], pp["s_head"], pp["b_head"], relu=False)
    e = pp["embed_size"]
    feature = out[:, :e]
    out_class = out[:, e:e + 7]
    return feature, out_class


# ---------------------------------------------------------------------------
# Self-tests + demo run
# ---------------------------------------------------------------------------
if __name__ == "__main__":
    def _rel_err(a, b):
        a = a.astype(jnp.float32)
        b = b.astype(jnp.float32)
        return float(jnp.linalg.norm(a - b) / (jnp.linalg.norm(b) + 1e-6))

    # 1) fused matmul (M/K tiling, N lane padding, epilogue).
    ka, kb, kc, kd_ = jax.random.split(jax.random.PRNGKey(42), 4)
    x_t = jax.random.normal(ka, (300, 1200), jnp.float32)
    w_t = jax.random.normal(kb, (1200, 45), jnp.float32)
    s_t = jax.random.normal(kc, (45,), jnp.float32)
    b_t = jax.random.normal(kd_, (45,), jnp.float32)
    got = fused_matmul(x_t, w_t, s_t, b_t, relu=True)
    ref = jnp.maximum(
        jnp.dot(x_t.astype(jnp.bfloat16).astype(jnp.float32),
                w_t.astype(jnp.bfloat16).astype(jnp.float32),
                precision=jax.lax.Precision.HIGHEST) * s_t + b_t, 0.0)
    assert _rel_err(got, ref) < 2e-2, "fused_matmul mismatch"

    # 2) dense strided direct conv vs lax.conv_general_dilated.
    k1, k2 = jax.random.split(jax.random.PRNGKey(7))
    xc = jax.random.normal(k1, (1, 4, 10, 10, 3), jnp.float32)
    wc = jax.random.normal(k2, (5, 3, 3, 3, 3), jnp.float32) * 0.2
    w5d = _dense_direct_weight(wc, 128)
    got = conv3d_direct(xc, w5d, jnp.ones((128,)), jnp.zeros((128,)),
                        ksize=(3, 3, 3), stride=(1, 2, 2), padding=(1, 1, 1),
                        relu=False, out_dtype=jnp.float32)[..., :5]
    ref = jax.lax.conv_general_dilated(
        xc.astype(jnp.bfloat16),
        jnp.transpose(wc, (2, 3, 4, 1, 0)).astype(jnp.bfloat16),
        window_strides=(1, 2, 2), padding=[(1, 1)] * 3,
        dimension_numbers=("NDHWC", "DHWIO", "NDHWC"),
        preferred_element_type=jnp.float32)
    assert _rel_err(got, ref) < 2e-2, "direct conv (dense, strided) mismatch"

    # 3) grouped + chunked direct conv vs lax grouped conv.
    k3, k4 = jax.random.split(jax.random.PRNGKey(11))
    xg = jax.random.normal(k3, (1, 4, 6, 6, 256), jnp.float32)
    wg = jax.random.normal(k4, (256, 64, 3, 3, 3), jnp.float32) * 0.05
    w5g, nchunks = _grouped_direct_weight(wg, 4, 256)
    assert nchunks == 2
    got = conv3d_direct(xg, w5g, jnp.ones((256,)), jnp.zeros((256,)),
                        ksize=(3, 3, 3), stride=(2, 2, 2), padding=(1, 1, 1),
                        relu=False, n_chunks=nchunks, out_dtype=jnp.float32)
    ref = jax.lax.conv_general_dilated(
        xg.astype(jnp.bfloat16),
        jnp.transpose(wg, (2, 3, 4, 1, 0)).astype(jnp.bfloat16),
        window_strides=(2, 2, 2), padding=[(1, 1)] * 3,
        dimension_numbers=("NDHWC", "DHWIO", "NDHWC"),
        feature_group_count=4, preferred_element_type=jnp.float32)
    assert _rel_err(got, ref) < 2e-2, "grouped direct conv mismatch"

    # 4) fused maxpool vs reduce_window (exact).
    k5 = jax.random.PRNGKey(3)
    xm = jax.random.normal(k5, (1, 6, 10, 10, 128), jnp.float32).astype(jnp.bfloat16)
    got = maxpool3d_cl(xm)
    ref = jax.lax.reduce_window(
        xm, jnp.asarray(-jnp.inf, jnp.bfloat16), jax.lax.max,
        (1, 3, 3, 3, 1), (1, 2, 2, 2, 1),
        [(0, 0), (1, 1), (1, 1), (1, 1), (0, 0)])
    assert bool(jnp.array_equal(got, ref)), "maxpool mismatch"

    # --- full model ---------------------------------------------------------
    key = jax.random.PRNGKey(0)
    pkey, xkey = jax.random.split(key)
    embed_size = 32
    params = init_params(pkey, embed_size)
    pp = prepare_params(params)
    # Small video clip: (batch=2, channels=3, frames=8, 32x32), NCDHW.
    x = jax.random.normal(xkey, (2, 3, 8, 32, 32), jnp.float32)
    feature, out_class = encoder_resnext3d_forward(pp, x)
    jax.block_until_ready(feature)
    jax.block_until_ready(out_class)
    assert feature.shape == (2, embed_size)
    assert out_class.shape == (2, 7)
    assert bool(jnp.all(jnp.isfinite(feature)))
    assert bool(jnp.all(jnp.isfinite(out_class)))
    print("KERNEL_OK")
</pallas_src>

<mosaic_0001>
module attributes {stable_mosaic.version = 11 : i64} {
  func.func @_fused_mm_kernel(%arg0: i32, %arg1: i32, %arg2: i32, %arg3: memref<304x512xbf16, #tpu.memory_space<vmem>>, %arg4: memref<512x128xbf16, #tpu.memory_space<vmem>>, %arg5: memref<1x128xf32, #tpu.memory_space<vmem>>, %arg6: memref<1x128xf32, #tpu.memory_space<vmem>>, %arg7: memref<304x128xf32, #tpu.memory_space<vmem>>, %arg8: memref<304x128xf32, #tpu.memory_space<vmem>>) attributes {dimension_semantics = [#tpu.dimension_semantics<parallel>, #tpu.dimension_semantics<parallel>, #tpu.dimension_semantics<arbitrary>], iteration_bounds = array<i64: 1, 1, 3>, scalar_prefetch = 0 : i64, scratch_operands = 1 : i64, tpu.core_type = #tpu.core_type<tc>, window_params = [{transform_indices = @transform_0, window_bounds = array<i64: 304, 512>}, {transform_indices = @transform_1, window_bounds = array<i64: 512, 128>}, {transform_indices = @transform_2, window_bounds = array<i64: 1, 128>}, {transform_indices = @transform_3, window_bounds = array<i64: 1, 128>}, {transform_indices = @transform_4, window_bounds = array<i64: 304, 128>}]} {
    %c0_i32 = arith.constant 0 : i32
    %0 = arith.cmpi eq, %arg2, %c0_i32 : i32
    %1 = arith.extui %0 : i1 to i32
    %c0_i32_0 = arith.constant 0 : i32
    %2 = arith.cmpi ne, %1, %c0_i32_0 : i32
    scf.if %2 {
      %cst_9 = arith.constant 0.000000e+00 : f32
      %12 = vector.broadcast %cst_9 : f32 to vector<304x128xf32>
      %c0_10 = arith.constant 0 : index
      %c0_11 = arith.constant 0 : index
      %13 = vector.load %arg8[%c0_10, %c0_11] : memref<304x128xf32, #tpu.memory_space<vmem>>, vector<304x128xf32>
      tpu.vector_store %arg8[%c0_10, %c0_11], %12 {strides = array<i32>} : memref<304x128xf32, #tpu.memory_space<vmem>>, vector<304x128xf32>,
    } else {
    }
    %c0 = arith.constant 0 : index
    %c0_1 = arith.constant 0 : index
    %3 = vector.load %arg8[%c0, %c0_1] : memref<304x128xf32, #tpu.memory_space<vmem>>, vector<304x128xf32>
    %c0_2 = arith.constant 0 : index
    %c0_3 = arith.constant 0 : index
    %4 = vector.load %arg3[%c0_2, %c0_3] : memref<304x512xbf16, #tpu.memory_space<vmem>>, vector<304x512xbf16>
    %c0_4 = arith.constant 0 : index
    %c0_5 = arith.constant 0 : index
    %5 = vector.load %arg4[%c0_4, %c0_5] : memref<512x128xbf16, #tpu.memory_space<vmem>>, vector<512x128xbf16>
    %cst = arith.constant dense<0.000000e+00> : vector<304x128xf32>
    %6 = tpu.matmul %4, %5, %cst {dimension_numbers = #tpu.dot_dimension_numbers<[1], [0], [0], [1], [0, 0, 1, 1], [], []>} : vector<304x512xbf16>, vector<512x128xbf16>, vector<304x128xf32> -> vector<304x128xf32>
    %7 = arith.addf %3, %6 : vector<304x128xf32>
    %c0_6 = arith.constant 0 : index
    %c0_7 = arith.constant 0 : index
    %8 = vector.load %arg8[%c0_6, %c0_7] : memref<304x128xf32, #tpu.memory_space<vmem>>, vector<304x128xf32>
    tpu.vector_store %arg8[%c0_6, %c0_7], %7 {strides = array<i32>} : memref<304x128xf32, #tpu.memory_space<vmem>>, vector<304x128xf32>,
    %c2_i32 = arith.constant 2 : i32
    %9 = arith.cmpi eq, %arg2, %c2_i32 : i32
    %10 = arith.extui %9 : i1 to i32
    %c0_i32_8 = arith.constant 0 : i32
    %11 = arith.cmpi ne, %10, %c0_i32_8 : i32
    scf.if %11 {
      %c0_9 = arith.constant 0 : index
      %c0_10 = arith.constant 0 : index
      %12 = vector.load %arg8[%c0_9, %c0_10] : memref<304x128xf32, #tpu.memory_space<vmem>>, vector<304x128xf32>
      %c0_11 = arith.constant 0 : index
      %c0_12 = arith.constant 0 : index
      %13 = vector.load %arg5[%c0_11, %c0_12] : memref<1x128xf32, #tpu.memory_space<vmem>>, vector<1x128xf32>
      %14 = vector.broadcast %13 : vector<1x128xf32> to vector<304x128xf32>
      %15 = arith.mulf %12, %14 : vector<304x128xf32>
      %c0_13 = arith.constant 0 : index
      %c0_14 = arith.constant 0 : index
      %16 = vector.load %arg6[%c0_13, %c0_14] : memref<1x128xf32, #tpu.memory_space<vmem>>, vector<1x128xf32>
      %17 = vector.broadcast %16 : vector<1x128xf32> to vector<304x128xf32>
      %18 = arith.addf %15, %17 : vector<304x128xf32>
      %cst_15 = arith.constant 0.000000e+00 : f32
      %19 = vector.broadcast %cst_15 : f32 to vector<304x128xf32>
      %20 = arith.maximumf %18, %19 : vector<304x128xf32>
      %c0_16 = arith.constant 0 : index
      %c0_17 = arith.constant 0 : index
      %21 = vector.load %arg7[%c0_16, %c0_17] : memref<304x128xf32, #tpu.memory_space<vmem>>, vector<304x128xf32>
      tpu.vector_store %arg7[%c0_16, %c0_17], %20 {strides = array<i32>} : memref<304x128xf32, #tpu.memory_space<vmem>>, vector<304x128xf32>,
    } else {
    }
    return
  }
  func.func @transform_0(%arg0: i32, %arg1: i32, %arg2: i32) -> (i32, i32) {
    %c0_i32 = arith.constant 0 : i32
    return %arg1, %arg2 : i32, i32
  }
  func.func @transform_1(%arg0: i32, %arg1: i32, %arg2: i32) -> (i32, i32) {
    %c0_i32 = arith.constant 0 : i32
    return %arg2, %arg0 : i32, i32
  }
  func.func @transform_2(%arg0: i32, %arg1: i32, %arg2: i32) -> (i32, i32) {
    %c0_i32 = arith.constant 0 : i32
    %c0_i32_0 = arith.constant 0 : i32
    return %c0_i32, %arg0 : i32, i32
  }
  func.func @transform_3(%arg0: i32, %arg1: i32, %arg2: i32) -> (i32, i32) {
    %c0_i32 = arith.constant 0 : i32
    %c0_i32_0 = arith.constant 0 : i32
    return %c0_i32, %arg0 : i32, i32
  }
  func.func @transform_4(%arg0: i32, %arg1: i32, %arg2: i32) -> (i32, i32) {
    %c0_i32 = arith.constant 0 : i32
    return %arg1, %arg0 : i32, i32
  }
}

</mosaic_0001>

<bundles_post_ra>
// kernel: tpu_custom_call.1
= control target key start
LH: loop header
LB: loop body
LE: loop exit
PB: predicated region body
PF: predicated region fallthrough
CT: control target
= control target key end

     0   :  { %9 = vsyncpa [#allocation4], 0  ;;  %s2850_s0 = inlined_call_operand.hbm [shape: bf16[304,1536], index: 0, kind: input, shape index: {}]   ;;  %s2851_s1 = inlined_call_operand.hbm [shape: bf16[1536,128], index: 1, kind: input, shape index: {}]   ;;  %s2852_s2 = inlined_call_operand.vmem [shape: f32[1,128], index: 2, kind: input, shape index: {}]   ;;  %s2853_s3 = inlined_call_operand.vmem [shape: f32[1,128], index: 3, kind: input, shape index: {}]   ;;  %s2854_s4 = inlined_call_operand.hbm [shape: f32[304,128], index: 4, kind: output, shape index: {}]  }
   0x1   :  { %11 = vsyncpa [#allocation4 + $0x1], 0 }
   0x2   :  { %12 = vsyncpa [#allocation7], 0 }
   0x3   :  { %14 = vsyncpa [#allocation7 + $0x1], 0 }
   0x4   :  { %15 = vsyncpa [#allocation5], 0  ;;  %s2425_s15 = smov 0   ;;  %s2427_s16 = smov 0  }
   0x5   :  { %s2429_s17 = smov 0   ;;  %s2431_s18 = smov 0  }
   0x6   :  { %s2433_s19 = smov 0   ;;  %s2435_s20 = smov 0  }
   0x7 LB: > { %s1888_s21 = sadd.s32 4294967295, %s2386_s20   ;;  %s33_s22 = sadd.s32 1, %s2382_s19  ;;  %s2386_s20 = sphi %s2435_s20, %s21_s20   ;;  %s2382_s19 = sphi %s2433_s19, %s2866_s19   ;;  %s2378_s18 = sphi %s2431_s18, %s2865_s18   ;;  %s2374_s17 = sphi %s2429_s17, %s2864_s17   ;;  %s2370_s16 = sphi %s2427_s16, %s2863_s16   ;;  %s2366_s15 = sphi %s2425_s15, %s2862_s15  }
   0x8   : > { %p34_p0 = scmp.ge.s32.totalorder %s33_s22, 3  ;;  %s49_s23 = sadd.s32 1, %s2374_s17 }
   0x9   : > { %p56_p1 = scmp.ne.s32.totalorder %s2374_s17, %s2370_s16  ;;  %p57_p2 = scmp.eq.s32.totalorder %s2386_s20, 0 }
   0xa   : > { %s2868_s22 = smov (%p34_p0, %s33_s22), 0  ;;  %p62_p4 = scmp.ne.s32.totalorder %s2370_s16, %s2366_s15 }
   0xb   : > { %p58_p3 = por %p57_p2, %p56_p1  ;;  %s45_s24 = ssub.s32 %s2382_s19, %s2868_s22 }
   0xc   : > { %p63_p5 = scmp.eq.s32.totalorder %s1888_s21, 0  ;;  %p47_p6 = scmp.eq.s32.totalorder %s45_s24, 0 }
   0xd   : > { %p2035_p8 = scmp.lt.s32.totalorder %s2386_s20, 3  ;;  %s2475_s27 = sand.u32 1, %s2374_s17  }
   0xe   : > { %p2466_p7 = por %p63_p5, %p62_p4  ;;  %s2016_s28 = sshll.u32 %s2382_s19, 8 }
   0xf   : > { %s2472_s26 = scalar_select %p47_p6, %s2374_s17, %s49_s23  }
  0x10   : > { %s2856_s25 = scalar_select %p2466_p7, 1, 0 }
  0x11   : > { %s2018_s29 = smul.u32 608, %s2475_s27  ;;  %s2482_s6 = scalar_lea.hbm %s2850_s0, %s2016_s28 }
  0x12   : > { %p2484_p9 = pnand %p2035_p8, %p58_p3  ;;  %s207_s10 = scalar_lea.sflag [#allocation4], %s2475_s27 }
  0x13   : > { %s210_s8 = scalar_lea.vmem [#allocation3], %s2018_s29  ;;  %s2242_s11 = scalar_lea.hbm %s2482_s6, 9728 }
  0x14   : > { %s220_s9 = sshll.u32 %s210_s8, 4  ;;  %p2243_p11 = scmp.ne.s32.totalorder %s2482_s6, %s2242_s11  ;;  %s2488_s9 = int_to_ptr.vmem [resolvable:$true] %s220_s9 }
  0x15   : > { %p2244_p12 = pneg %p2484_p9  ;;  %s2247_s14 = scalar_lea.hbm %s2850_s0, 29184 }
  0x16   : > { %p2248_p1 = scmp.lt.u32.totalorder %s2482_s6, %s2850_s0  ;;  %p2249_p2 = scmp.lt.u32.totalorder %s2247_s14, %s2242_s11 }
  0x17   : > { %p2245_p13 = pnand %p2244_p12, %p2243_p11  ;;  %p2251_p4 = scmp.lt.u32.totalorder %s2242_s11, %s2482_s6 }
  0x18   : > { %p2250_p3 = por %p2249_p2, %p2248_p1 }
  0x19   : > { %p2246_p0 = pneg %p2245_p13 }
  0x1a   : > { %p2252_p5 = por %p2251_p4, %p2250_p3 }
  0x1c   : > { %p2253_p6 = pnand %p2252_p5, %p2246_p0 }
  0x1e   : > { %2256 = shalt.err (!%p2253_p6)
}
  0x1f   : > { %s2257_s24 = scalar_lea.vmem %s2488_s9, 9728  ;;  %s2388_s28 = smov [#allocation3]  }
  0x20   : > { %p2258_p8 = scmp.ne.s32.totalorder %s2488_s9, %s2257_s24  ;;  %s2262_s29 = sshll.u32 %s2388_s28, 4  ;;  %s2263_s29 = int_to_ptr.vmem [resolvable:$false] %s2262_s29 }
  0x21   : > { %s2264_s30 = scalar_lea.vmem %s2263_s29, 19456  ;;  %p2265_p10 = scmp.lt.s32.totalorder %s2488_s9, %s2263_s29 }
  0x22   : > { %p2260_p11 = pnand %p2258_p8, %p2244_p12  ;;  %p2266_p1 = scmp.lt.s32.totalorder %s2264_s30, %s2257_s24 }
  0x24   : > { %p2261_p13 = pneg %p2260_p11  ;;  %p2267_p2 = por %p2266_p1, %p2265_p10 }
  0x26   : > { %p2268_p3 = pnand %p2267_p2, %p2261_p13 }
  0x28   : > { %2271 = shalt.err (!%p2268_p3)
}
  0x29   : > { %s2389_s5 = smov 768   ;;  %s2390_s8 = smov 256  }
  0x2a   : > { %s2391_s11 = smov 16   ;;  %p250_p0 = scmp.lt.s32.totalorder %s2386_s20, 4 }
  0x2b   : > { %2031 = dma.hbm_to_vmem [thread:$0]  (!%p2484_p9), %s2482_s6, 9728, %s2488_s9, %s207_s10, %s2389_s5, %s2390_s8, %s2391_s11  }
  0x2c   : > { %s1895_s12 = sshll.u32 %s2475_s27, 8  ;;  %s2017_s13 = sshll.u32 %s2382_s19, 12 }
  0x2d   : > { %p2858_p10 = scmp.ge.s32.totalorder %s2386_s20, 1  ;;  %s2531_s24 = scalar_lea.hbm %s2851_s1, %s2017_s13 }
  0x2e   : > { %s234_s28 = scalar_lea.vmem [#allocation6], %s1895_s12  ;;  %s231_s6 = scalar_lea.sflag [#allocation7], %s2475_s27 }
  0x2f   : > { %p2524_p4 = pnand %p2858_p10, %p250_p0  ;;  %s242_s29 = sshll.u32 %s234_s28, 4  ;;  %s2533_s29 = int_to_ptr.vmem [resolvable:$true] %s242_s29 }
  0x30   : > { %s2272_s9 = scalar_lea.hbm %s2531_s24, 4096  ;;  %s2277_s5 = scalar_lea.hbm %s2851_s1, 12288 }
  0x31   : > { %p2273_p5 = scmp.ne.s32.totalorder %s2531_s24, %s2272_s9  ;;  %p2278_p11 = scmp.lt.u32.totalorder %s2531_s24, %s2851_s1 }
  0x32   : > { %p2279_p13 = scmp.lt.u32.totalorder %s2277_s5, %s2272_s9  ;;  %p2281_p2 = scmp.lt.u32.totalorder %s2272_s9, %s2531_s24 }
  0x33   : > { %p2275_p6 = pnand %p2273_p5, %p2244_p12 }
  0x34   : > { %p2280_p1 = por %p2279_p13, %p2278_p11 }
  0x35   : > { %p2276_p8 = pneg %p2275_p6 }
  0x36   : > { %p2282_p3 = por %p2281_p2, %p2280_p1 }
  0x38   : > { %p2283_p0 = pnand %p2282_p3, %p2276_p8 }
  0x3a   : > { %2286 = shalt.err (!%p2283_p0)
}
  0x3b   : > { %s2287_s12 = scalar_lea.vmem %s2533_s29, 4096  ;;  %s2392_s13 = smov [#allocation6]  }
  0x3c   : > { %p2288_p10 = scmp.ne.s32.totalorder %s2533_s29, %s2287_s12  ;;  %s2292_s15 = sshll.u32 %s2392_s13, 4  ;;  %s2293_s15 = int_to_ptr.vmem [resolvable:$false] %s2292_s15 }
  0x3d   : > { %s2294_s23 = scalar_lea.vmem %s2293_s15, 8192  ;;  %p2295_p7 = scmp.lt.s32.totalorder %s2533_s29, %s2293_s15 }
  0x3e   : > { %p2290_p5 = pnand %p2288_p10, %p2244_p12  ;;  %p2296_p11 = scmp.lt.s32.totalorder %s2294_s23, %s2287_s12 }
  0x40   : > { %p2291_p6 = pneg %p2290_p5  ;;  %p2297_p13 = por %p2296_p11, %p2295_p7 }
  0x42   : > { %p2298_p1 = pnand %p2297_p13, %p2291_p6 }
  0x44   : > { %2301 = shalt.err (!%p2298_p1)
}
  0x45   : > { %s2393_s28 = smov 64   ;;  %s2394_s9 = smov 4  }
  0x46   : > { %2034 = dma.hbm_to_vmem [thread:$0]  (!%p2484_p9), %s2531_s24, 4096, %s2533_s29, %s231_s6, %s2393_s28, %s2393_s28, %s2394_s9  }
  0x47   : > { %254 = sbr.rel (%p2524_p4) target bundleno = 573 (0x23d), region = 36  ;;  %s256_s10 = sand.u32 (!%p2524_p4), 1, %s2370_s16  }
  0x48   : > { %s2019_s30 = smul.u32 (!%p2524_p4), 608, %s256_s10  ;;  %s257_s5 = scalar_lea.sflag (!%p2524_p4), [#allocation4], %s256_s10 }
  0x49   : > { %p2860_p7 = scmp.ne.s32.totalorder (!%p2524_p4), %s2856_s25, 0 }
  0x4a   : > { %s2564_s8 = scalar_lea.vmem (!%p2524_p4), [#allocation3], %s2019_s30 }
  0x4e   : > { %2353 = dma.done.wait (%p2860_p7), %s257_s5, 9728  }
  0x4f   : > { %2355 = vsyncadd (%p2860_p7), %s257_s5, 4294957568  ;;  %s1899_s11 = sshll.u32 %s256_s10, 8  ;;  %s266_s7 = scalar_lea.sflag [#allocation7], %s256_s10 }
  0x50   : > { %s2570_s27 = scalar_lea.vmem [#allocation6], %s1899_s11 }
  0x51   : > { %2357 = dma.done.wait (%p2860_p7), %s266_s7, 4096  }
  0x52   : > { %2359 = vsyncadd (%p2860_p7), %s266_s7, 4294963200  ;;  %p1900_p9 = scmp.ne.s32.totalorder %s2378_s18, 0 }
  0x53   : > { %v2395_v0 = vmov (!%p1900_p9), 0.0  }
  0x54   : > { %314 = sbr.rel (%p1900_p9) target bundleno = 103 (0x67), region = 48  ;;  %315 = vst [vmem:[#allocation2] sm:$0xff] (!%p1900_p9), %v2395_v0  ;;  %316 = vst [vmem:[#allocation2 + $0x8] sm:$0xff] (!%p1900_p9), %v2395_v0 }
  0x55   : > { %317 = vst [vmem:[#allocation2 + $0x10] sm:$0xff] (!%p1900_p9), %v2395_v0  ;;  %318 = vst [vmem:[#allocation2 + $0x18] sm:$0xff] (!%p1900_p9), %v2395_v0 }
  0x56   : > { %319 = vst [vmem:[#allocation2 + $0x20] sm:$0xff] (!%p1900_p9), %v2395_v0  ;;  %320 = vst [vmem:[#allocation2 + $0x28] sm:$0xff] (!%p1900_p9), %v2395_v0 }
  0x57   : > { %321 = vst [vmem:[#allocation2 + $0x30] sm:$0xff] (!%p1900_p9), %v2395_v0  ;;  %322 = vst [vmem:[#allocation2 + $0x38] sm:$0xff] (!%p1900_p9), %v2395_v0 }
  0x58   : > { %323 = vst [vmem:[#allocation2 + $0x40] sm:$0xff] (!%p1900_p9), %v2395_v0  ;;  %324 = vst [vmem:[#allocation2 + $0x48] sm:$0xff] (!%p1900_p9), %v2395_v0 }
  0x59   : > { %325 = vst [vmem:[#allocation2 + $0x50] sm:$0xff] (!%p1900_p9), %v2395_v0  ;;  %326 = vst [vmem:[#allocation2 + $0x58] sm:$0xff] (!%p1900_p9), %v2395_v0 }
  0x5a   : > { %327 = vst [vmem:[#allocation2 + $0x60] sm:$0xff] (!%p1900_p9), %v2395_v0  ;;  %328 = vst [vmem:[#allocation2 + $0x68] sm:$0xff] (!%p1900_p9), %v2395_v0 }
  0x5b   : > { %329 = vst [vmem:[#allocation2 + $0x70] sm:$0xff] %v2395_v0  ;;  %330 = vst [vmem:[#allocation2 + $0x78] sm:$0xff] %v2395_v0 }
  0x5c   : > { %331 = vst [vmem:[#allocation2 + $0x80] sm:$0xff] %v2395_v0  ;;  %332 = vst [vmem:[#allocation2 + $0x88] sm:$0xff] %v2395_v0 }
  0x5d   : > { %333 = vst [vmem:[#allocation2 + $0x90] sm:$0xff] %v2395_v0  ;;  %334 = vst [vmem:[#allocation2 + $0x98] sm:$0xff] %v2395_v0 }
  0x5e   : > { %335 = vst [vmem:[#allocation2 + $0xa0] sm:$0xff] %v2395_v0  ;;  %336 = vst [vmem:[#allocation2 + $0xa8] sm:$0xff] %v2395_v0 }
  0x5f   : > { %337 = vst [vmem:[#allocation2 + $0xb0] sm:$0xff] %v2395_v0  ;;  %338 = vst [vmem:[#allocation2 + $0xb8] sm:$0xff] %v2395_v0 }
  0x60   : > { %339 = vst [vmem:[#allocation2 + $0xc0] sm:$0xff] %v2395_v0  ;;  %340 = vst [vmem:[#allocation2 + $0xc8] sm:$0xff] %v2395_v0 }
  0x61   : > { %341 = vst [vmem:[#allocation2 + $0xd0] sm:$0xff] %v2395_v0  ;;  %342 = vst [vmem:[#allocation2 + $0xd8] sm:$0xff] %v2395_v0 }
  0x62   : > { %343 = vst [vmem:[#allocation2 + $0xe0] sm:$0xff] %v2395_v0  ;;  %344 = vst [vmem:[#allocation2 + $0xe8] sm:$0xff] %v2395_v0 }
  0x63   : > { %345 = vst [vmem:[#allocation2 + $0xf0] sm:$0xff] %v2395_v0  ;;  %346 = vst [vmem:[#allocation2 + $0xf8] sm:$0xff] %v2395_v0 }
  0x64   : > { %347 = vst [vmem:[#allocation2 + $0x100] sm:$0xff] %v2395_v0  ;;  %348 = vst [vmem:[#allocation2 + $0x108] sm:$0xff] %v2395_v0 }
  0x65   : > { %349 = vst [vmem:[#allocation2 + $0x110] sm:$0xff] %v2395_v0  ;;  %350 = vst [vmem:[#allocation2 + $0x118] sm:$0xff] %v2395_v0 }
  0x66   : > { %351 = vst [vmem:[#allocation2 + $0x120] sm:$0xff] %v2395_v0  ;;  %352 = vst [vmem:[#allocation2 + $0x128] sm:$0xff] %v2395_v0 }
  0x67 PF: > { %v2096_v1 = vld [vmem:[%s2570_s27] sm:$0xff]   ;;  %v2396_v2 = vmov 0   ;;  %v2098_v4 = vld [vmem:[%s2570_s27 + $0x8] sm:$0xff]   ;;  %v2100_v6 = vld [vmem:[%s2570_s27 + $0x10] sm:$0xff]   ;;  %p2009_p12 = scmp.ne.s32.totalorder %s2378_s18, 2 }
  0x68   : > { %1103 = vmatprep.subr.bf16.mxu0 %v2396_v2  ;;  %1288 = vmatprep.subr.bf16.mxu1 %v2396_v2  ;;  %v2097_v3 = vld [vmem:[%s2570_s27 + $0x80] sm:$0xff]   ;;  %v2099_v5 = vld [vmem:[%s2570_s27 + $0x88] sm:$0xff]   ;;  %v2101_v7 = vld [vmem:[%s2570_s27 + $0x90] sm:$0xff]  }
  0x69   : > { %1104 = vmatpush1.bf16.msra.mxu0 %v2096_v1  ;;  %1289 = vmatpush1.bf16.msra.mxu1 %v2097_v3  ;;  %v2102_v8 = vld [vmem:[%s2570_s27 + $0x18] sm:$0xff]   ;;  %v2104_v10 = vld [vmem:[%s2570_s27 + $0x20] sm:$0xff]   ;;  %v2106_v12 = vld [vmem:[%s2570_s27 + $0x28] sm:$0xff]  }
  0x6a   : > { %1105 = vmatprep.subr.bf16.mxu0 %v2396_v2  ;;  %1290 = vmatprep.subr.bf16.mxu1 %v2396_v2  ;;  %v2103_v9 = vld [vmem:[%s2570_s27 + $0x98] sm:$0xff]   ;;  %v2105_v11 = vld [vmem:[%s2570_s27 + $0xa0] sm:$0xff]   ;;  %v2107_v13 = vld [vmem:[%s2570_s27 + $0xa8] sm:$0xff]  }
  0x6b   : > { %v2108_v14 = vld [vmem:[%s2570_s27 + $0x30] sm:$0xff]   ;;  %v2110_v16 = vld [vmem:[%s2570_s27 + $0x38] sm:$0xff]   ;;  %v2112_v18 = vld [vmem:[%s2570_s27 + $0x40] sm:$0xff]  }
  0x6c   : > { %v2109_v15 = vld [vmem:[%s2570_s27 + $0xb0] sm:$0xff]   ;;  %v2111_v17 = vld [vmem:[%s2570_s27 + $0xb8] sm:$0xff]   ;;  %v2113_v19 = vld [vmem:[%s2570_s27 + $0xc0] sm:$0xff]  }
  0x6d   : > { %1106 = vmatpush1.bf16.msra.mxu0 %v2098_v4  ;;  %1291 = vmatpush1.bf16.msra.mxu1 %v2099_v5  ;;  %v2130_v20 = vld [vmem:[%s2564_s8 + $0x4] ss:$16 sps:$4 sm:$0xff]   ;;  %v2114_v21 = vld [vmem:[%s2570_s27 + $0x48] sm:$0xff]   ;;  %v2118_v26 = vld [vmem:[%s2570_s27 + $0x58] sm:$0xff]  }
  0x6e   : > { %1107 = vmatprep.subr.bf16.mxu0 %v2396_v2  ;;  %1292 = vmatprep.subr.bf16.mxu1 %v2396_v2  ;;  %v2133_v22 = vld [vmem:[%s2564_s8 + $0xc] ss:$16 sps:$4 sm:$0xff]   ;;  %v2116_v24 = vld [vmem:[%s2570_s27 + $0x50] sm:$0xff]   ;;  %v2120_v28 = vld [vmem:[%s2570_s27 + $0x60] sm:$0xff]  }
  0x6f   : > { %v2115_v23 = vld [vmem:[%s2570_s27 + $0xc8] sm:$0xff]   ;;  %1135 = vmatprep.mubr.bf16.mxu0 %v2130_v20  ;;  %1320 = vmatprep.mubr.bf16.mxu1 %v2133_v22  ;;  %v2117_v25 = vld [vmem:[%s2570_s27 + $0xd0] sm:$0xff]   ;;  %v2119_v27 = vld [vmem:[%s2570_s27 + $0xd8] sm:$0xff]  }
  0x70   : > { %v2121_v29 = vld [vmem:[%s2570_s27 + $0xe0] sm:$0xff]   ;;  %v2122_v30 = vld [vmem:[%s2570_s27 + $0x68] sm:$0xff]   ;;  %v2124_v32 = vld [vmem:[%s2570_s27 + $0x70] sm:$0xff]  }
  0x71   : > { %1108 = vmatpush1.bf16.msra.mxu0 %v2100_v6  ;;  %1293 = vmatpush1.bf16.msra.mxu1 %v2101_v7  ;;  %v2123_v31 = vld [vmem:[%s2570_s27 + $0xe8] sm:$0xff]   ;;  %v2125_v33 = vld [vmem:[%s2570_s27 + $0xf0] sm:$0xff]   ;;  %v2126_v34 = vld [vmem:[%s2570_s27 + $0x78] sm:$0xff]  }
  0x72   : > { %1109 = vmatprep.subr.bf16.mxu0 %v2396_v2  ;;  %1294 = vmatprep.subr.bf16.mxu1 %v2396_v2  ;;  %v2127_v35 = vld [vmem:[%s2570_s27 + $0xf8] sm:$0xff]   ;;  %v2128_v36 = vld [vmem:[%s2564_s8] ss:$16 sps:$4 sm:$0xff]   ;;  %v2134_v38 = vld [vmem:[%s2564_s8 + $0x24] ss:$16 sps:$4 sm:$0xff]  }
  0x73   : > { %v2131_v37 = vld [vmem:[%s2564_s8 + $0x8] ss:$16 sps:$4 sm:$0xff]   ;;  %v2136_v39 = vld [vmem:[%s2564_s8 + $0x2c] ss:$16 sps:$4 sm:$0xff]   ;;  %v2138_v40 = vld [vmem:[%s2564_s8 + $0x20] ss:$16 sps:$4 sm:$0xff]  }
  0x74   : > { %v2139_v41 = vld [vmem:[%s2564_s8 + $0x28] ss:$16 sps:$4 sm:$0xff]   ;;  %v2140_v42 = vld [vmem:[%s2564_s8 + $0x44] ss:$16 sps:$4 sm:$0xff]   ;;  %v2142_v43 = vld [vmem:[%s2564_s8 + $0x4c] ss:$16 sps:$4 sm:$0xff]  }
  0x75   : > { %1110 = vmatpush1.bf16.msra.mxu0 %v2102_v8  ;;  %1295 = vmatpush1.bf16.msra.mxu1 %v2103_v9  ;;  %v2144_v44 = vld [vmem:[%s2564_s8 + $0x40] ss:$16 sps:$4 sm:$0xff]   ;;  %v2145_v45 = vld [vmem:[%s2564_s8 + $0x48] ss:$16 sps:$4 sm:$0xff]   ;;  %v2146_v46 = vld [vmem:[%s2564_s8 + $0x64] ss:$16 sps:$4 sm:$0xff]  }
  0x76   : > { %1111 = vmatprep.subr.bf16.mxu0 %v2396_v2  ;;  %1296 = vmatprep.subr.bf16.mxu1 %v2396_v2  ;;  %v2148_v47 = vld [vmem:[%s2564_s8 + $0x6c] ss:$16 sps:$4 sm:$0xff]   ;;  %v2150_v48 = vld [vmem:[%s2564_s8 + $0x60] ss:$16 sps:$4 sm:$0xff]   ;;  %v2151_v49 = vld [vmem:[%s2564_s8 + $0x68] ss:$16 sps:$4 sm:$0xff]  }
  0x77   : > { %v2152_v50 = vld [vmem:[%s2564_s8 + $0x84] ss:$16 sps:$4 sm:$0xff]   ;;  %v2154_v51 = vld [vmem:[%s2564_s8 + $0x8c] ss:$16 sps:$4 sm:$0xff]   ;;  %v2156_v52 = vld [vmem:[%s2564_s8 + $0x80] ss:$16 sps:$4 sm:$0xff]  }
  0x78   : > { %v2157_v53 = vld [vmem:[%s2564_s8 + $0x88] ss:$16 sps:$4 sm:$0xff]   ;;  %v2158_v54 = vld [vmem:[%s2564_s8 + $0xa4] ss:$16 sps:$4 sm:$0xff]   ;;  %v2160_v55 = vld [vmem:[%s2564_s8 + $0xac] ss:$16 sps:$4 sm:$0xff]  }
  0x79   : > { %1112 = vmatpush1.bf16.msra.mxu0 %v2104_v10  ;;  %1297 = vmatpush1.bf16.msra.mxu1 %v2105_v11  ;;  %v2162_v56 = vld [vmem:[%s2564_s8 + $0xa0] ss:$16 sps:$4 sm:$0xff]   ;;  %v2163_v57 = vld [vmem:[%s2564_s8 + $0xa8] ss:$16 sps:$4 sm:$0xff]   ;;  %v2164_v58 = vld [vmem:[%s2564_s8 + $0xc4] ss:$16 sps:$4 sm:$0xff]  }
  0x7a   : > { %1113 = vmatprep.subr.bf16.mxu0 %v2396_v2  ;;  %1298 = vmatprep.subr.bf16.mxu1 %v2396_v2  ;;  %v2166_v59 = vld [vmem:[%s2564_s8 + $0xcc] ss:$16 sps:$4 sm:$0xff]   ;;  %v2168_v60 = vld [vmem:[%s2564_s8 + $0xc0] ss:$16 sps:$4 sm:$0xff]   ;;  %v2169_v61 = vld [vmem:[%s2564_s8 + $0xc8] ss:$16 sps:$4 sm:$0xff]  }
  0x7b   : > { %v2170_v62 = vld [vmem:[%s2564_s8 + $0xe4] ss:$16 sps:$4 sm:$0xff]   ;;  %v2172_v63 = vld [vmem:[%s2564_s8 + $0xec] ss:$16 sps:$4 sm:$0xff]   ;;  %v2174_v0 = vld [vmem:[%s2564_s8 + $0xe0] ss:$16 sps:$4 sm:$0xff]  }
  0x7c   : > { %v2175_v1 = vld [vmem:[%s2564_s8 + $0xe8] ss:$16 sps:$4 sm:$0xff]   ;;  %v2178_v3 = vld [vmem:[%s2564_s8 + $0x10c] ss:$16 sps:$4 sm:$0xff]   ;;  %v2180_v4 = vld [vmem:[%s2564_s8 + $0x100] ss:$16 sps:$4 sm:$0xff]  }
  0x7d   : > { %1114 = vmatpush1.bf16.msra.mxu0 %v2106_v12  ;;  %1299 = vmatpush1.bf16.msra.mxu1 %v2107_v13  ;;  %v2181_v5 = vld [vmem:[%s2564_s8 + $0x108] ss:$16 sps:$4 sm:$0xff]   ;;  %v2182_v6 = vld [vmem:[%s2564_s8 + $0x124] ss:$16 sps:$4 sm:$0xff]   ;;  %v2184_v7 = vld [vmem:[%s2564_s8 + $0x12c] ss:$16 sps:$4 sm:$0xff]  }
  0x7e   : > { %1115 = vmatprep.subr.bf16.mxu0 %v2396_v2  ;;  %1300 = vmatprep.subr.bf16.mxu1 %v2396_v2  ;;  %v2186_v8 = vld [vmem:[%s2564_s8 + $0x120] ss:$16 sps:$4 sm:$0xff]   ;;  %v2187_v9 = vld [vmem:[%s2564_s8 + $0x128] ss:$16 sps:$4 sm:$0xff]   ;;  %v2188_v10 = vld [vmem:[%s2564_s8 + $0x144] ss:$16 sps:$4 sm:$0xff]  }
  0x7f   : > { %v2190_v11 = vld [vmem:[%s2564_s8 + $0x14c] ss:$16 sps:$4 sm:$0xff]   ;;  %v2192_v12 = vld [vmem:[%s2564_s8 + $0x140] ss:$16 sps:$4 sm:$0xff]   ;;  %v2193_v13 = vld [vmem:[%s2564_s8 + $0x148] ss:$16 sps:$4 sm:$0xff]  }
  0x80   : > { %v2204_v20 = vld [vmem:[%s2564_s8 + $0x180] ss:$16 sps:$4 sm:$0xff]   ;;  %v2206_v22 = vld [vmem:[%s2564_s8 + $0x1a4] ss:$16 sps:$4 sm:$0xff]  }
  0x81   : > { %1116 = vmatpush1.bf16.msra.mxu0 %v2108_v14  ;;  %1301 = vmatpush1.bf16.msra.mxu1 %v2109_v15  ;;  %v2194_v14 = vld [vmem:[%s2564_s8 + $0x164] ss:$16 sps:$4 sm:$0xff]   ;;  %v2196_v15 = vld [vmem:[%s2564_s8 + $0x16c] ss:$16 sps:$4 sm:$0xff]  }
  0x82   : > { %1117 = vmatprep.subr.bf16.mxu0 %v2396_v2  ;;  %1302 = vmatprep.subr.bf16.mxu1 %v2396_v2 }
  0x85   : > { %1118 = vmatpush1.bf16.msra.mxu0 %v2110_v16  ;;  %1303 = vmatpush1.bf16.msra.mxu1 %v2111_v17  ;;  %v2198_v16 = vld [vmem:[%s2564_s8 + $0x160] ss:$16 sps:$4 sm:$0xff]   ;;  %v2199_v17 = vld [vmem:[%s2564_s8 + $0x168] ss:$16 sps:$4 sm:$0xff]  }
  0x86   : > { %1119 = vmatprep.subr.bf16.mxu0 %v2396_v2  ;;  %1304 = vmatprep.subr.bf16.mxu1 %v2396_v2 }
  0x89   : > { %1120 = vmatpush1.bf16.msra.mxu0 %v2112_v18  ;;  %1305 = vmatpush1.bf16.msra.mxu1 %v2113_v19  ;;  %v2200_v18 = vld [vmem:[%s2564_s8 + $0x184] ss:$16 sps:$4 sm:$0xff]   ;;  %v2202_v19 = vld [vmem:[%s2564_s8 + $0x18c] ss:$16 sps:$4 sm:$0xff]  }
  0x8a   : > { %1121 = vmatprep.subr.bf16.mxu0 %v2396_v2  ;;  %1306 = vmatprep.subr.bf16.mxu1 %v2396_v2 }
  0x8d   : > { %1122 = vmatpush1.bf16.msra.mxu0 %v2114_v21  ;;  %1307 = vmatpush1.bf16.msra.mxu1 %v2115_v23  ;;  %v2205_v21 = vld [vmem:[%s2564_s8 + $0x188] ss:$16 sps:$4 sm:$0xff]   ;;  %v2208_v23 = vld [vmem:[%s2564_s8 + $0x1ac] ss:$16 sps:$4 sm:$0xff]  }
  0x8e   : > { %1123 = vmatprep.subr.bf16.mxu0 %v2396_v2  ;;  %1308 = vmatprep.subr.bf16.mxu1 %v2396_v2 }
  0x91   : > { %1124 = vmatpush1.bf16.msra.mxu0 %v2116_v24  ;;  %1309 = vmatpush1.bf16.msra.mxu1 %v2117_v25  ;;  %v2210_v24 = vld [vmem:[%s2564_s8 + $0x1a0] ss:$16 sps:$4 sm:$0xff]   ;;  %v2211_v25 = vld [vmem:[%s2564_s8 + $0x1a8] ss:$16 sps:$4 sm:$0xff]  }
  0x92   : > { %1125 = vmatprep.subr.bf16.mxu0 %v2396_v2  ;;  %1310 = vmatprep.subr.bf16.mxu1 %v2396_v2 }
  0x95   : > { %1126 = vmatpush1.bf16.msra.mxu0 %v2118_v26  ;;  %1311 = vmatpush1.bf16.msra.mxu1 %v2119_v27  ;;  %v2212_v26 = vld [vmem:[%s2564_s8 + $0x1c4] ss:$16 sps:$4 sm:$0xff]   ;;  %v2214_v27 = vld [vmem:[%s2564_s8 + $0x1cc] ss:$16 sps:$4 sm:$0xff]  }
  0x96   : > { %1127 = vmatprep.subr.bf16.mxu0 %v2396_v2  ;;  %1312 = vmatprep.subr.bf16.mxu1 %v2396_v2 }
  0x99   : > { %1128 = vmatpush1.bf16.msra.mxu0 %v2120_v28  ;;  %1313 = vmatpush1.bf16.msra.mxu1 %v2121_v29  ;;  %v2216_v28 = vld [vmem:[%s2564_s8 + $0x1c0] ss:$16 sps:$4 sm:$0xff]   ;;  %v2217_v29 = vld [vmem:[%s2564_s8 + $0x1c8] ss:$16 sps:$4 sm:$0xff]  }
  0x9a   : > { %1129 = vmatprep.subr.bf16.mxu0 %v2396_v2  ;;  %1314 = vmatprep.subr.bf16.mxu1 %v2396_v2 }
  0x9d   : > { %1130 = vmatpush1.bf16.msra.mxu0 %v2122_v30  ;;  %1315 = vmatpush1.bf16.msra.mxu1 %v2123_v31  ;;  %v2218_v30 = vld [vmem:[%s2564_s8 + $0x1e4] ss:$16 sps:$4 sm:$0xff]   ;;  %v2220_v31 = vld [vmem:[%s2564_s8 + $0x1ec] ss:$16 sps:$4 sm:$0xff]  }
  0x9e   : > { %1131 = vmatprep.subr.bf16.mxu0 %v2396_v2  ;;  %1316 = vmatprep.subr.bf16.mxu1 %v2396_v2 }
  0xa1   : > { %1132 = vmatpush1.bf16.msra.mxu0 %v2124_v32  ;;  %1317 = vmatpush1.bf16.msra.mxu1 %v2125_v33  ;;  %v2222_v32 = vld [vmem:[%s2564_s8 + $0x1e0] ss:$16 sps:$4 sm:$0xff]   ;;  %v2223_v33 = vld [vmem:[%s2564_s8 + $0x1e8] ss:$16 sps:$4 sm:$0xff]  }
  0xa2   : > { %1133 = vmatprep.subr.bf16.mxu0 %v2396_v2  ;;  %1318 = vmatprep.subr.bf16.mxu1 %v2396_v2  ;;  %v2176_v2 = vld [vmem:[%s2564_s8 + $0x104] ss:$16 sps:$4 sm:$0xff]  }
  0xa5   : > { %1134 = vmatpush1.bf16.msra.mxu0 %v2126_v34  ;;  %1319 = vmatpush1.bf16.msra.mxu1 %v2127_v35  ;;  %v2224_v34 = vld [vmem:[%s2564_s8 + $0x204] ss:$16 sps:$4 sm:$0xff]   ;;  %v2226_v35 = vld [vmem:[%s2564_s8 + $0x20c] ss:$16 sps:$4 sm:$0xff]  }
  0xa8   : > { %1136 = vmatmul.mubr.bf16.vlgmr.msra.gmra.mrb[0].mxu0 %v2128_v36  ;;  %1321 = vmatmul.mubr.bf16.vlgmr.msra.gmra.mrb[0].mxu1 %v2131_v37  ;;  %v2228_v36 = vld [vmem:[%s2564_s8 + $0x200] ss:$16 sps:$4 sm:$0xff]   ;;  %v2229_v37 = vld [vmem:[%s2564_s8 + $0x208] ss:$16 sps:$4 sm:$0xff]  }
  0xa9   : > { %1143 = vmatprep.mubr.bf16.mxu0 %v2134_v38  ;;  %1328 = vmatprep.mubr.bf16.mxu1 %v2136_v39  ;;  %v2230_v38 = vld [vmem:[%s2564_s8 + $0x224] ss:$16 sps:$4 sm:$0xff]   ;;  %v2232_v39 = vld [vmem:[%s2564_s8 + $0x22c] ss:$16 sps:$4 sm:$0xff]  }
  0xb0   : > { %1144 = vmatmul.mubr.bf16.gmra.mrb[4].mxu0 %v2138_v40  ;;  %1329 = vmatmul.mubr.bf16.gmra.mrb[4].mxu1 %v2139_v41  ;;  %v2234_v40 = vld [vmem:[%s2564_s8 + $0x220] ss:$16 sps:$4 sm:$0xff]   ;;  %v2235_v41 = vld [vmem:[%s2564_s8 + $0x228] ss:$16 sps:$4 sm:$0xff]  }
  0xb1   : > { %1151 = vmatprep.mubr.bf16.mxu0 %v2140_v42  ;;  %1336 = vmatprep.mubr.bf16.mxu1 %v2142_v43  ;;  %v2236_v42 = vld [vmem:[%s2564_s8 + $0x244] ss:$16 sps:$4 sm:$0xff]   ;;  %v2238_v43 = vld [vmem:[%s2564_s8 + $0x24c] ss:$16 sps:$4 sm:$0xff]  }
  0xb8   : > { %1152 = vmatmul.mubr.bf16.gmra.mrb[8].mxu0 %v2144_v44  ;;  %1337 = vmatmul.mubr.bf16.gmra.mrb[8].mxu1 %v2145_v45  ;;  %v2240_v44 = vld [vmem:[%s2564_s8 + $0x240] ss:$16 sps:$4 sm:$0xff]   ;;  %v2241_v45 = vld [vmem:[%s2564_s8 + $0x248] ss:$16 sps:$4 sm:$0xff]  }
  0xb9   : > { %1159 = vmatprep.mubr.bf16.mxu0 %v2146_v46  ;;  %1344 = vmatprep.mubr.bf16.mxu1 %v2148_v47  ;;  %v353_v47 = vld [vmem:[#allocation2] sm:$0xff] }
  0xc0   : > { %1160 = vmatmul.mubr.bf16.gmra.mrb[12].mxu0 %v2150_v48  ;;  %1345 = vmatmul.mubr.bf16.gmra.mrb[12].mxu1 %v2151_v49 }
  0xc1   : > { %1167 = vmatprep.mubr.bf16.mxu0 %v2152_v50  ;;  %1352 = vmatprep.mubr.bf16.mxu1 %v2154_v51 }
  0xc8   : > { %1168 = vmatmul.mubr.bf16.gmra.mrb[16].mxu0 %v2156_v52  ;;  %1353 = vmatmul.mubr.bf16.gmra.mrb[16].mxu1 %v2157_v53  ;;  %v354_v53 = vld [vmem:[#allocation2 + $0x8] sm:$0xff] }
  0xc9   : > { %1175 = vmatprep.mubr.bf16.mxu0 %v2158_v54  ;;  %1360 = vmatprep.mubr.bf16.mxu1 %v2160_v55 }
  0xd0   : > { %1176 = vmatmul.mubr.bf16.gmra.mrb[20].mxu0 %v2162_v56  ;;  %1361 = vmatmul.mubr.bf16.gmra.mrb[20].mxu1 %v2163_v57 }
  0xd1   : > { %1183 = vmatprep.mubr.bf16.mxu0 %v2164_v58  ;;  %1368 = vmatprep.mubr.bf16.mxu1 %v2166_v59 }
  0xd8   : > { %1184 = vmatmul.mubr.bf16.gmra.mrb[24].mxu0 %v2168_v60  ;;  %1369 = vmatmul.mubr.bf16.gmra.mrb[24].mxu1 %v2169_v61  ;;  %v355_v61 = vld [vmem:[#allocation2 + $0x10] sm:$0xff] }
  0xd9   : > { %1191 = vmatprep.mubr.bf16.mxu0 %v2170_v62  ;;  %1376 = vmatprep.mubr.bf16.mxu1 %v2172_v63 }
  0xe0   : > { %1192 = vmatmul.mubr.bf16.gmra.mrb[28].mxu0 %v2174_v0  ;;  %1377 = vmatmul.mubr.bf16.gmra.mrb[28].mxu1 %v2175_v1 }
  0xe1   : > { %1199 = vmatprep.mubr.bf16.mxu0 %v2176_v2  ;;  %1384 = vmatprep.mubr.bf16.mxu1 %v2178_v3  ;;  %v356_v3 = vld [vmem:[#allocation2 + $0x18] sm:$0xff] }
  0xe8   : > { %1200 = vmatmul.mubr.bf16.gmra.mrb[32].mxu0 %v2180_v4  ;;  %1385 = vmatmul.mubr.bf16.gmra.mrb[32].mxu1 %v2181_v5 }
  0xe9   : > { %1207 = vmatprep.mubr.bf16.mxu0 %v2182_v6  ;;  %1392 = vmatprep.mubr.bf16.mxu1 %v2184_v7 }
  0xf0   : > { %1208 = vmatmul.mubr.bf16.gmra.mrb[36].mxu0 %v2186_v8  ;;  %1393 = vmatmul.mubr.bf16.gmra.mrb[36].mxu1 %v2187_v9 }
  0xf1   : > { %1215 = vmatprep.mubr.bf16.mxu0 %v2188_v10  ;;  %1400 = vmatprep.mubr.bf16.mxu1 %v2190_v11  ;;  %v357_v11 = vld [vmem:[#allocation2 + $0x20] sm:$0xff] }
  0xf8   : > { %1216 = vmatmul.mubr.bf16.gmra.mrb[40].mxu0 %v2192_v12  ;;  %1401 = vmatmul.mubr.bf16.gmra.mrb[40].mxu1 %v2193_v13 }
  0xf9   : > { %1223 = vmatprep.mubr.bf16.mxu0 %v2194_v14  ;;  %1408 = vmatprep.mubr.bf16.mxu1 %v2196_v15 }
 0x100   : > { %1224 = vmatmul.mubr.bf16.gmra.mrb[44].mxu0 %v2198_v16  ;;  %1409 = vmatmul.mubr.bf16.gmra.mrb[44].mxu1 %v2199_v17  ;;  %v358_v17 = vld [vmem:[#allocation2 + $0x28] sm:$0xff] }
 0x101   : > { %1231 = vmatprep.mubr.bf16.mxu0 %v2200_v18  ;;  %1416 = vmatprep.mubr.bf16.mxu1 %v2202_v19 }
 0x108   : > { %1232 = vmatmul.mubr.bf16.gmra.mrb[48].mxu0 %v2204_v20  ;;  %1417 = vmatmul.mubr.bf16.gmra.mrb[48].mxu1 %v2205_v21 }
 0x109   : > { %1239 = vmatprep.mubr.bf16.mxu0 %v2206_v22  ;;  %1424 = vmatprep.mubr.bf16.mxu1 %v2208_v23 }
 0x110   : > { %1240 = vmatmul.mubr.bf16.gmra.mrb[52].mxu0 %v2210_v24  ;;  %1425 = vmatmul.mubr.bf16.gmra.mrb[52].mxu1 %v2211_v25  ;;  %v359_v25 = vld [vmem:[#allocation2 + $0x30] sm:$0xff] }
 0x111   : > { %1247 = vmatprep.mubr.bf16.mxu0 %v2212_v26  ;;  %1432 = vmatprep.mubr.bf16.mxu1 %v2214_v27 }
 0x118   : > { %1248 = vmatmul.mubr.bf16.gmra.mrb[56].mxu0 %v2216_v28  ;;  %1433 = vmatmul.mubr.bf16.gmra.mrb[56].mxu1 %v2217_v29 }
 0x119   : > { %1255 = vmatprep.mubr.bf16.mxu0 %v2218_v30  ;;  %1440 = vmatprep.mubr.bf16.mxu1 %v2220_v31  ;;  %v360_v31 = vld [vmem:[#allocation2 + $0x38] sm:$0xff] }
 0x120   : > { %1256 = vmatmul.mubr.bf16.gmra.mrb[60].mxu0 %v2222_v32  ;;  %1441 = vmatmul.mubr.bf16.gmra.mrb[60].mxu1 %v2223_v33 }
 0x121   : > { %1263 = vmatprep.mubr.bf16.mxu0 %v2224_v34  ;;  %1448 = vmatprep.mubr.bf16.mxu1 %v2226_v35 }
 0x128   : > { %1264 = vmatmul.mubr.bf16.gmra.mrb[64].mxu0 %v2228_v36  ;;  %1449 = vmatmul.mubr.bf16.gmra.mrb[64].mxu1 %v2229_v37 }
 0x129   : > { %1271 = vmatprep.mubr.bf16.mxu0 %v2230_v38  ;;  %1456 = vmatprep.mubr.bf16.mxu1 %v2232_v39  ;;  %v361_v39 = vld [vmem:[#allocation2 + $0x40] sm:$0xff] }
 0x130   : > { %1272 = vmatmul.mubr.bf16.gmra.mrb[68].mxu0 %v2234_v40  ;;  %1457 = vmatmul.mubr.bf16.gmra.mrb[68].mxu1 %v2235_v41 }
 0x131   : > { %1279 = vmatprep.mubr.bf16.mxu0 %v2236_v42  ;;  %1464 = vmatprep.mubr.bf16.mxu1 %v2238_v43 }
 0x138   : > { %1280 = vmatmul.mubr.bf16.gmra.mrb[72].mxu0 %v2240_v44  ;;  %1465 = vmatmul.mubr.bf16.gmra.mrb[72].mxu1 %v2241_v45  ;;  %v362_v45 = vld [vmem:[#allocation2 + $0x48] sm:$0xff] }
 0x17b   : > { %v1137_v46 = vpop.f32.mrb[0].mxu0  ;;  %v1322_v48 = vpop.f32.mrb[0].mxu1 }
 0x17c   : > { %v1139_v49 = vpop.f32.mrb[1].mxu0  ;;  %v1323_v50 = vadd.f32 %v1322_v48, %v1137_v46  ;;  %v1324_v51 = vpop.f32.mrb[1].mxu1 }
 0x17d   : > { %v1140_v52 = vpop.f32.mrb[2].mxu0  ;;  %v1325_v54 = vpop.f32.mrb[2].mxu1 }
 0x17e   : > { %v1142_v55 = vpop.f32.mrb[3].mxu0  ;;  %v1473_v56 = vadd.f32 %v1323_v50, %v353_v47  ;;  %v1326_v57 = vadd.f32 %v1325_v54, %v1140_v52  ;;  %v1327_v58 = vpop.f32.mrb[3].mxu1 }
 0x180   : > { %1511 = vst [vmem:[#allocation2] sm:$0xff] %v1473_v56  ;;  %v1474_v59 = vadd.f32 %v1326_v57, %v354_v53  ;;  %v363_v53 = vld [vmem:[#allocation2 + $0x50] sm:$0xff] }
 0x182   : > { %1512 = vst [vmem:[#allocation2 + $0x8] sm:$0xff] %v1474_v59  ;;  %v364_v59 = vld [vmem:[#allocation2 + $0x58] sm:$0xff] }
 0x183   : > { %v1145_v60 = vpop.f32.mrb[4].mxu0  ;;  %v1330_v62 = vpop.f32.mrb[4].mxu1 }
 0x184   : > { %v1147_v63 = vpop.f32.mrb[5].mxu0  ;;  %v1331_v0 = vadd.f32 %v1330_v62, %v1145_v60  ;;  %v1332_v1 = vpop.f32.mrb[5].mxu1 }
 0x185   : > { %v1148_v2 = vpop.f32.mrb[6].mxu0  ;;  %v1333_v4 = vpop.f32.mrb[6].mxu1 }
 0x186   : > { %v1150_v5 = vpop.f32.mrb[7].mxu0  ;;  %v1475_v6 = vadd.f32 %v1331_v0, %v355_v61  ;;  %v1334_v7 = vadd.f32 %v1333_v4, %v1148_v2  ;;  %v1335_v8 = vpop.f32.mrb[7].mxu1 }
 0x188   : > { %1513 = vst [vmem:[#allocation2 + $0x10] sm:$0xff] %v1475_v6  ;;  %v1476_v9 = vadd.f32 %v1334_v7, %v356_v3  ;;  %v365_v3 = vld [vmem:[#allocation2 + $0x60] sm:$0xff] }
 0x18a   : > { %1514 = vst [vmem:[#allocation2 + $0x18] sm:$0xff] %v1476_v9  ;;  %v366_v9 = vld [vmem:[#allocation2 + $0x68] sm:$0xff] }
 0x18b   : > { %v1153_v10 = vpop.f32.mrb[8].mxu0  ;;  %v1338_v12 = vpop.f32.mrb[8].mxu1 }
 0x18c   : > { %v1155_v13 = vpop.f32.mrb[9].mxu0  ;;  %v1339_v14 = vadd.f32 %v1338_v12, %v1153_v10  ;;  %v1340_v15 = vpop.f32.mrb[9].mxu1 }
 0x18d   : > { %v1156_v16 = vpop.f32.mrb[10].mxu0  ;;  %v1341_v18 = vpop.f32.mrb[10].mxu1 }
 0x18e   : > { %v1158_v19 = vpop.f32.mrb[11].mxu0  ;;  %v1477_v20 = vadd.f32 %v1339_v14, %v357_v11  ;;  %v1342_v21 = vadd.f32 %v1341_v18, %v1156_v16  ;;  %v1343_v22 = vpop.f32.mrb[11].mxu1 }
 0x190   : > { %1515 = vst [vmem:[#allocation2 + $0x20] sm:$0xff] %v1477_v20  ;;  %v1478_v23 = vadd.f32 %v1342_v21, %v358_v17  ;;  %v367_v17 = vld [vmem:[#allocation2 + $0x70] sm:$0xff] }
 0x192   : > { %1516 = vst [vmem:[#allocation2 + $0x28] sm:$0xff] %v1478_v23  ;;  %v368_v23 = vld [vmem:[#allocation2 + $0x78] sm:$0xff] }
 0x193   : > { %v1161_v24 = vpop.f32.mrb[12].mxu0  ;;  %v1346_v26 = vpop.f32.mrb[12].mxu1 }
 0x194   : > { %v1163_v27 = vpop.f32.mrb[13].mxu0  ;;  %v1347_v28 = vadd.f32 %v1346_v26, %v1161_v24  ;;  %v1348_v29 = vpop.f32.mrb[13].mxu1 }
 0x195   : > { %v1164_v30 = vpop.f32.mrb[14].mxu0  ;;  %v1349_v32 = vpop.f32.mrb[14].mxu1 }
 0x196   : > { %v1166_v33 = vpop.f32.mrb[15].mxu0  ;;  %v1479_v34 = vadd.f32 %v1347_v28, %v359_v25  ;;  %v1350_v35 = vadd.f32 %v1349_v32, %v1164_v30  ;;  %v1351_v36 = vpop.f32.mrb[15].mxu1 }
 0x198   : > { %1517 = vst [vmem:[#allocation2 + $0x30] sm:$0xff] %v1479_v34  ;;  %v1480_v37 = vadd.f32 %v1350_v35, %v360_v31  ;;  %v369_v31 = vld [vmem:[#allocation2 + $0x80] sm:$0xff] }
 0x19a   : > { %1518 = vst [vmem:[#allocation2 + $0x38] sm:$0xff] %v1480_v37  ;;  %v370_v37 = vld [vmem:[#allocation2 + $0x88] sm:$0xff] }
 0x19b   : > { %v1169_v38 = vpop.f32.mrb[16].mxu0  ;;  %v1354_v40 = vpop.f32.mrb[16].mxu1 }
 0x19c   : > { %v1171_v41 = vpop.f32.mrb[17].mxu0  ;;  %v1355_v42 = vadd.f32 %v1354_v40, %v1169_v38  ;;  %v1356_v43 = vpop.f32.mrb[17].mxu1 }
 0x19d   : > { %v1172_v44 = vpop.f32.mrb[18].mxu0  ;;  %v1357_v46 = vpop.f32.mrb[18].mxu1 }
 0x19e   : > { %v1174_v47 = vpop.f32.mrb[19].mxu0  ;;  %v1481_v48 = vadd.f32 %v1355_v42, %v361_v39  ;;  %v1358_v49 = vadd.f32 %v1357_v46, %v1172_v44  ;;  %v1359_v50 = vpop.f32.mrb[19].mxu1 }
 0x1a0   : > { %1519 = vst [vmem:[#allocation2 + $0x40] sm:$0xff] %v1481_v48  ;;  %v1482_v51 = vadd.f32 %v1358_v49, %v362_v45  ;;  %v371_v45 = vld [vmem:[#allocation2 + $0x90] sm:$0xff] }
 0x1a2   : > { %1520 = vst [vmem:[#allocation2 + $0x48] sm:$0xff] %v1482_v51  ;;  %v372_v51 = vld [vmem:[#allocation2 + $0x98] sm:$0xff] }
 0x1a3   : > { %v1177_v52 = vpop.f32.mrb[20].mxu0  ;;  %v1362_v54 = vpop.f32.mrb[20].mxu1 }
 0x1a4   : > { %v1179_v55 = vpop.f32.mrb[21].mxu0  ;;  %v1363_v56 = vadd.f32 %v1362_v54, %v1177_v52  ;;  %v1364_v57 = vpop.f32.mrb[21].mxu1 }
 0x1a5   : > { %v1180_v58 = vpop.f32.mrb[22].mxu0  ;;  %v1365_v60 = vpop.f32.mrb[22].mxu1 }
 0x1a6   : > { %v1182_v61 = vpop.f32.mrb[23].mxu0  ;;  %v1483_v62 = vadd.f32 %v1363_v56, %v363_v53  ;;  %v1366_v63 = vadd.f32 %v1365_v60, %v1180_v58  ;;  %v1367_v0 = vpop.f32.mrb[23].mxu1 }
 0x1a8   : > { %1521 = vst [vmem:[#allocation2 + $0x50] sm:$0xff] %v1483_v62  ;;  %v1484_v1 = vadd.f32 %v1366_v63, %v364_v59  ;;  %v373_v59 = vld [vmem:[#allocation2 + $0xa0] sm:$0xff] }
 0x1aa   : > { %1522 = vst [vmem:[#allocation2 + $0x58] sm:$0xff] %v1484_v1  ;;  %v374_v1 = vld [vmem:[#allocation2 + $0xa8] sm:$0xff] }
 0x1ab   : > { %v1185_v2 = vpop.f32.mrb[24].mxu0  ;;  %v1370_v4 = vpop.f32.mrb[24].mxu1 }
 0x1ac   : > { %v1187_v5 = vpop.f32.mrb[25].mxu0  ;;  %v1371_v6 = vadd.f32 %v1370_v4, %v1185_v2  ;;  %v1372_v7 = vpop.f32.mrb[25].mxu1 }
 0x1ad   : > { %v1188_v8 = vpop.f32.mrb[26].mxu0  ;;  %v1373_v10 = vpop.f32.mrb[26].mxu1 }
 0x1ae   : > { %v1190_v11 = vpop.f32.mrb[27].mxu0  ;;  %v1485_v12 = vadd.f32 %v1371_v6, %v365_v3  ;;  %v1374_v13 = vadd.f32 %v1373_v10, %v1188_v8  ;;  %v1375_v14 = vpop.f32.mrb[27].mxu1 }
 0x1b0   : > { %1523 = vst [vmem:[#allocation2 + $0x60] sm:$0xff] %v1485_v12  ;;  %v1486_v15 = vadd.f32 %v1374_v13, %v366_v9  ;;  %v375_v9 = vld [vmem:[#allocation2 + $0xb0] sm:$0xff] }
 0x1b2   : > { %1524 = vst [vmem:[#allocation2 + $0x68] sm:$0xff] %v1486_v15  ;;  %v376_v15 = vld [vmem:[#allocation2 + $0xb8] sm:$0xff] }
 0x1b3   : > { %v1193_v16 = vpop.f32.mrb[28].mxu0  ;;  %v1378_v18 = vpop.f32.mrb[28].mxu1 }
 0x1b4   : > { %v1195_v19 = vpop.f32.mrb[29].mxu0  ;;  %v1379_v20 = vadd.f32 %v1378_v18, %v1193_v16  ;;  %v1380_v21 = vpop.f32.mrb[29].mxu1 }
 0x1b5   : > { %v1196_v22 = vpop.f32.mrb[30].mxu0  ;;  %v1381_v24 = vpop.f32.mrb[30].mxu1 }
 0x1b6   : > { %v1198_v25 = vpop.f32.mrb[31].mxu0  ;;  %v1487_v26 = vadd.f32 %v1379_v20, %v367_v17  ;;  %v1382_v27 = vadd.f32 %v1381_v24, %v1196_v22  ;;  %v1383_v28 = vpop.f32.mrb[31].mxu1 }
 0x1b8   : > { %1525 = vst [vmem:[#allocation2 + $0x70] sm:$0xff] %v1487_v26  ;;  %v1488_v29 = vadd.f32 %v1382_v27, %v368_v23  ;;  %v377_v23 = vld [vmem:[#allocation2 + $0xc0] sm:$0xff] }
 0x1ba   : > { %1526 = vst [vmem:[#allocation2 + $0x78] sm:$0xff] %v1488_v29  ;;  %v378_v29 = vld [vmem:[#allocation2 + $0xc8] sm:$0xff] }
 0x1bb   : > { %v1201_v30 = vpop.f32.mrb[32].mxu0  ;;  %v1386_v32 = vpop.f32.mrb[32].mxu1 }
 0x1bc   : > { %v1203_v33 = vpop.f32.mrb[33].mxu0  ;;  %v1387_v34 = vadd.f32 %v1386_v32, %v1201_v30  ;;  %v1388_v35 = vpop.f32.mrb[33].mxu1 }
 0x1bd   : > { %v1204_v36 = vpop.f32.mrb[34].mxu0  ;;  %v1389_v38 = vpop.f32.mrb[34].mxu1 }
 0x1be   : > { %v1206_v39 = vpop.f32.mrb[35].mxu0  ;;  %v1489_v40 = vadd.f32 %v1387_v34, %v369_v31  ;;  %v1390_v41 = vadd.f32 %v1389_v38, %v1204_v36  ;;  %v1391_v42 = vpop.f32.mrb[35].mxu1 }
 0x1c0   : > { %1527 = vst [vmem:[#allocation2 + $0x80] sm:$0xff] %v1489_v40  ;;  %v1490_v43 = vadd.f32 %v1390_v41, %v370_v37  ;;  %v379_v37 = vld [vmem:[#allocation2 + $0xd0] sm:$0xff] }
 0x1c2   : > { %1528 = vst [vmem:[#allocation2 + $0x88] sm:$0xff] %v1490_v43  ;;  %v380_v43 = vld [vmem:[#allocation2 + $0xd8] sm:$0xff] }
 0x1c3   : > { %v1209_v44 = vpop.f32.mrb[36].mxu0  ;;  %v1394_v46 = vpop.f32.mrb[36].mxu1 }
 0x1c4   : > { %v1211_v47 = vpop.f32.mrb[37].mxu0  ;;  %v1395_v48 = vadd.f32 %v1394_v46, %v1209_v44  ;;  %v1396_v49 = vpop.f32.mrb[37].mxu1 }
 0x1c5   : > { %v1212_v50 = vpop.f32.mrb[38].mxu0  ;;  %v1397_v52 = vpop.f32.mrb[38].mxu1 }
 0x1c6   : > { %v1214_v53 = vpop.f32.mrb[39].mxu0  ;;  %v1491_v54 = vadd.f32 %v1395_v48, %v371_v45  ;;  %v1398_v55 = vadd.f32 %v1397_v52, %v1212_v50  ;;  %v1399_v56 = vpop.f32.mrb[39].mxu1 }
 0x1c8   : > { %1529 = vst [vmem:[#allocation2 + $0x90] sm:$0xff] %v1491_v54  ;;  %v1492_v57 = vadd.f32 %v1398_v55, %v372_v51  ;;  %v381_v51 = vld [vmem:[#allocation2 + $0xe0] sm:$0xff] }
 0x1ca   : > { %1530 = vst [vmem:[#allocation2 + $0x98] sm:$0xff] %v1492_v57  ;;  %v382_v57 = vld [vmem:[#allocation2 + $0xe8] sm:$0xff] }
 0x1cb   : > { %v1217_v58 = vpop.f32.mrb[40].mxu0  ;;  %v1402_v60 = vpop.f32.mrb[40].mxu1 }
 0x1cc   : > { %v1219_v61 = vpop.f32.mrb[41].mxu0  ;;  %v1403_v62 = vadd.f32 %v1402_v60, %v1217_v58  ;;  %v1404_v63 = vpop.f32.mrb[41].mxu1 }
 0x1cd   : > { %v1220_v0 = vpop.f32.mrb[42].mxu0  ;;  %v1405_v2 = vpop.f32.mrb[42].mxu1 }
 0x1ce   : > { %v1222_v3 = vpop.f32.mrb[43].mxu0  ;;  %v1493_v4 = vadd.f32 %v1403_v62, %v373_v59  ;;  %v1406_v5 = vadd.f32 %v1405_v2, %v1220_v0  ;;  %v1407_v6 = vpop.f32.mrb[43].mxu1 }
 0x1d0   : > { %1531 = vst [vmem:[#allocation2 + $0xa0] sm:$0xff] %v1493_v4  ;;  %v1494_v7 = vadd.f32 %v1406_v5, %v374_v1  ;;  %v383_v1 = vld [vmem:[#allocation2 + $0xf0] sm:$0xff] }
 0x1d2   : > { %1532 = vst [vmem:[#allocation2 + $0xa8] sm:$0xff] %v1494_v7  ;;  %v384_v7 = vld [vmem:[#allocation2 + $0xf8] sm:$0xff] }
 0x1d3   : > { %v1225_v8 = vpop.f32.mrb[44].mxu0  ;;  %v1410_v10 = vpop.f32.mrb[44].mxu1 }
 0x1d4   : > { %v1227_v11 = vpop.f32.mrb[45].mxu0  ;;  %v1411_v12 = vadd.f32 %v1410_v10, %v1225_v8  ;;  %v1412_v13 = vpop.f32.mrb[45].mxu1 }
 0x1d5   : > { %v1228_v14 = vpop.f32.mrb[46].mxu0  ;;  %v1413_v16 = vpop.f32.mrb[46].mxu1 }
 0x1d6   : > { %v1230_v17 = vpop.f32.mrb[47].mxu0  ;;  %v1495_v18 = vadd.f32 %v1411_v12, %v375_v9  ;;  %v1414_v19 = vadd.f32 %v1413_v16, %v1228_v14  ;;  %v1415_v20 = vpop.f32.mrb[47].mxu1 }
 0x1d8   : > { %1533 = vst [vmem:[#allocation2 + $0xb0] sm:$0xff] %v1495_v18  ;;  %v1496_v21 = vadd.f32 %v1414_v19, %v376_v15  ;;  %v385_v15 = vld [vmem:[#allocation2 + $0x100] sm:$0xff] }
 0x1da   : > { %1534 = vst [vmem:[#allocation2 + $0xb8] sm:$0xff] %v1496_v21  ;;  %v386_v21 = vld [vmem:[#allocation2 + $0x108] sm:$0xff] }
 0x1db   : > { %v1233_v22 = vpop.f32.mrb[48].mxu0  ;;  %v1418_v24 = vpop.f32.mrb[48].mxu1 }
 0x1dc   : > { %v1235_v25 = vpop.f32.mrb[49].mxu0  ;;  %v1419_v26 = vadd.f32 %v1418_v24, %v1233_v22  ;;  %v1420_v27 = vpop.f32.mrb[49].mxu1 }
 0x1dd   : > { %v1236_v28 = vpop.f32.mrb[50].mxu0  ;;  %v1421_v30 = vpop.f32.mrb[50].mxu1 }
 0x1de   : > { %v1238_v31 = vpop.f32.mrb[51].mxu0  ;;  %v1497_v32 = vadd.f32 %v1419_v26, %v377_v23  ;;  %v1422_v33 = vadd.f32 %v1421_v30, %v1236_v28  ;;  %v1423_v34 = vpop.f32.mrb[51].mxu1 }
 0x1e0   : > { %1535 = vst [vmem:[#allocation2 + $0xc0] sm:$0xff] %v1497_v32  ;;  %v1498_v35 = vadd.f32 %v1422_v33, %v378_v29  ;;  %v387_v29 = vld [vmem:[#allocation2 + $0x110] sm:$0xff] }
 0x1e2   : > { %1536 = vst [vmem:[#allocation2 + $0xc8] sm:$0xff] %v1498_v35  ;;  %v388_v35 = vld [vmem:[#allocation2 + $0x118] sm:$0xff] }
 0x1e3   : > { %v1241_v36 = vpop.f32.mrb[52].mxu0  ;;  %v1426_v38 = vpop.f32.mrb[52].mxu1 }
 0x1e4   : > { %v1243_v39 = vpop.f32.mrb[53].mxu0  ;;  %v1427_v40 = vadd.f32 %v1426_v38, %v1241_v36  ;;  %v1428_v41 = vpop.f32.mrb[53].mxu1 }
 0x1e5   : > { %v1244_v42 = vpop.f32.mrb[54].mxu0  ;;  %v1429_v44 = vpop.f32.mrb[54].mxu1 }
 0x1e6   : > { %v1246_v45 = vpop.f32.mrb[55].mxu0  ;;  %v1499_v46 = vadd.f32 %v1427_v40, %v379_v37  ;;  %v1430_v47 = vadd.f32 %v1429_v44, %v1244_v42  ;;  %v1431_v48 = vpop.f32.mrb[55].mxu1 }
 0x1e8   : > { %1537 = vst [vmem:[#allocation2 + $0xd0] sm:$0xff] %v1499_v46  ;;  %v1500_v49 = vadd.f32 %v1430_v47, %v380_v43  ;;  %v389_v43 = vld [vmem:[#allocation2 + $0x120] sm:$0xff] }
 0x1ea   : > { %1538 = vst [vmem:[#allocation2 + $0xd8] sm:$0xff] %v1500_v49  ;;  %v390_v49 = vld [vmem:[#allocation2 + $0x128] sm:$0xff] }
 0x1eb   : > { %v1249_v50 = vpop.f32.mrb[56].mxu0  ;;  %v1434_v52 = vpop.f32.mrb[56].mxu1 }
 0x1ec   : > { %v1251_v53 = vpop.f32.mrb[57].mxu0  ;;  %v1435_v54 = vadd.f32 %v1434_v52, %v1249_v50  ;;  %v1436_v55 = vpop.f32.mrb[57].mxu1 }
 0x1ed   : > { %v1252_v56 = vpop.f32.mrb[58].mxu0  ;;  %v1437_v58 = vpop.f32.mrb[58].mxu1 }
 0x1ee   : > { %v1254_v59 = vpop.f32.mrb[59].mxu0  ;;  %v1501_v60 = vadd.f32 %v1435_v54, %v381_v51  ;;  %v1438_v61 = vadd.f32 %v1437_v58, %v1252_v56  ;;  %v1439_v62 = vpop.f32.mrb[59].mxu1  ;;  %v1553_v56 = vld [vmem:[#allocation2] sm:$0xff] (!%p2009_p12) }
 0x1ef   : > { %v2726_v58 = vld [vmem:[%s2853_s3] ss:$0 sm:$0xff] (!%p2009_p12)  ;;  %v1556_v62 = vld [vmem:[#allocation2 + $0x18] sm:$0xff] (!%p2009_p12) }
 0x1f0   : > { %1539 = vst [vmem:[#allocation2 + $0xe0] sm:$0xff] %v1501_v60  ;;  %v1502_v63 = vadd.f32 %v1438_v61, %v382_v57  ;;  %v2721_v57 = vld [vmem:[%s2852_s2] ss:$0 sm:$0xff] (!%p2009_p12)  ;;  %v1554_v60 = vld [vmem:[#allocation2 + $0x8] sm:$0xff] (!%p2009_p12)  ;;  %v1555_v61 = vld [vmem:[#allocation2 + $0x10] sm:$0xff] (!%p2009_p12) }
 0x1f1   : > { %v1598_v59 = vmul.f32 (!%p2009_p12), %v2721_v57, %v1553_v56 }
 0x1f2   : > { %1540 = vst [vmem:[#allocation2 + $0xe8] sm:$0xff] %v1502_v63  ;;  %v1599_v63 = vmul.f32 (!%p2009_p12), %v2721_v57, %v1554_v60  ;;  %v1573_v60 = vld [vmem:[#allocation2 + $0xa0] sm:$0xff] (!%p2009_p12) }
 0x1f3   : > { %v1257_v0 = vpop.f32.mrb[60].mxu0  ;;  %v1442_v2 = vpop.f32.mrb[60].mxu1 }
 0x1f4   : > { %v1259_v3 = vpop.f32.mrb[61].mxu0  ;;  %v1443_v4 = vadd.f32 %v1442_v2, %v1257_v0  ;;  %v1444_v5 = vpop.f32.mrb[61].mxu1  ;;  %v1600_v0 = vmul.f32 (!%p2009_p12), %v2721_v57, %v1555_v61  ;;  %v1557_v2 = vld [vmem:[#allocation2 + $0x20] sm:$0xff] (!%p2009_p12)  ;;  %v1574_v61 = vld [vmem:[#allocation2 + $0xa8] sm:$0xff] (!%p2009_p12) }
 0x1f5   : > { %v1260_v6 = vpop.f32.mrb[62].mxu0  ;;  %v1445_v8 = vpop.f32.mrb[62].mxu1  ;;  %v1558_v3 = vld [vmem:[#allocation2 + $0x28] sm:$0xff] (!%p2009_p12)  ;;  %v1643_v5 = vadd.f32 (!%p2009_p12), %v2726_v58, %v1598_v59 }
 0x1f6   : > { %v1262_v9 = vpop.f32.mrb[63].mxu0  ;;  %v1503_v10 = vadd.f32 %v1443_v4, %v383_v1  ;;  %v1446_v11 = vadd.f32 %v1445_v8, %v1260_v6  ;;  %v1447_v12 = vpop.f32.mrb[63].mxu1  ;;  %v1601_v1 = vmul.f32 (!%p2009_p12), %v2721_v57, %v1556_v62  ;;  %v1559_v4 = vld [vmem:[#allocation2 + $0x30] sm:$0xff] (!%p2009_p12)  ;;  %v1602_v6 = vmul.f32 (!%p2009_p12), %v2721_v57, %v1557_v2 }
 0x1f7   : > { %v1604_v8 = vmul.f32 (!%p2009_p12), %v2721_v57, %v1559_v4  ;;  %v1560_v9 = vld [vmem:[#allocation2 + $0x38] sm:$0xff] (!%p2009_p12)  ;;  %v1575_v62 = vld [vmem:[#allocation2 + $0xb0] sm:$0xff] (!%p2009_p12) }
 0x1f8   : > { %1541 = vst [vmem:[#allocation2 + $0xf0] sm:$0xff] %v1503_v10  ;;  %v1504_v13 = vadd.f32 %v1446_v11, %v384_v7  ;;  %v1603_v7 = vmul.f32 (!%p2009_p12), %v2721_v57, %v1558_v3  ;;  %v1644_v10 = vadd.f32 (!%p2009_p12), %v2726_v58, %v1599_v63  ;;  %v1645_v11 = vadd.f32 (!%p2009_p12), %v2726_v58, %v1600_v0  ;;  %v1576_v3 = vld [vmem:[#allocation2 + $0xb8] sm:$0xff] (!%p2009_p12) }
 0x1f9   : > { %v1646_v12 = vadd.f32 (!%p2009_p12), %v2726_v58, %v1601_v1 }
 0x1fa   : > { %1542 = vst [vmem:[#allocation2 + $0xf8] sm:$0xff] %v1504_v13  ;;  %v1605_v13 = vmul.f32 (!%p2009_p12), %v2721_v57, %v1560_v9  ;;  %v1618_v9 = vmul.f32 (!%p2009_p12), %v2721_v57, %v1573_v60 }
 0x1fb   : > { %v1265_v14 = vpop.f32.mrb[64].mxu0  ;;  %v1450_v16 = vpop.f32.mrb[64].mxu1 }
 0x1fc   : > { %v1267_v17 = vpop.f32.mrb[65].mxu0  ;;  %v1451_v18 = vadd.f32 %v1450_v16, %v1265_v14  ;;  %v1452_v19 = vpop.f32.mrb[65].mxu1  ;;  %v1561_v14 = vld [vmem:[#allocation2 + $0x40] sm:$0xff] (!%p2009_p12)  ;;  %v1647_v16 = vadd.f32 (!%p2009_p12), %v2726_v58, %v1602_v6 }
 0x1fd   : > { %v1268_v20 = vpop.f32.mrb[66].mxu0  ;;  %v1453_v22 = vpop.f32.mrb[66].mxu1  ;;  %v1648_v17 = vadd.f32 (!%p2009_p12), %v2726_v58, %v1603_v7  ;;  %v1562_v19 = vld [vmem:[#allocation2 + $0x48] sm:$0xff] (!%p2009_p12) }
 0x1fe   : > { %v1270_v23 = vpop.f32.mrb[67].mxu0  ;;  %v1505_v24 = vadd.f32 %v1451_v18, %v385_v15  ;;  %v1454_v25 = vadd.f32 %v1453_v22, %v1268_v20  ;;  %v1455_v26 = vpop.f32.mrb[67].mxu1  ;;  %v1681_v15 = vmax.f32 (!%p2009_p12), %v1643_v5, 0.0  ;;  %v1649_v18 = vadd.f32 (!%p2009_p12), %v2726_v58, %v1604_v8  ;;  %v1563_v20 = vld [vmem:[#allocation2 + $0x50] sm:$0xff] (!%p2009_p12) }
 0x1ff   : > { %v1682_v22 = vmax.f32 (!%p2009_p12), %v1644_v10, 0.0  ;;  %v1683_v23 = vmax.f32 (!%p2009_p12), %v1645_v11, 0.0  ;;  %v1565_v26 = vld [vmem:[#allocation2 + $0x60] sm:$0xff] (!%p2009_p12)  ;;  %v1619_v10 = vmul.f32 (!%p2009_p12), %v2721_v57, %v1574_v61  ;;  %v1620_v11 = vmul.f32 (!%p2009_p12), %v2721_v57, %v1575_v62 }
 0x200   : > { %1543 = vst [vmem:[#allocation2 + $0x100] sm:$0xff] %v1505_v24  ;;  %v1506_v27 = vadd.f32 %v1454_v25, %v386_v21  ;;  %v1564_v21 = vld [vmem:[#allocation2 + $0x58] sm:$0xff] (!%p2009_p12)  ;;  %v1684_v24 = vmax.f32 (!%p2009_p12), %v1646_v12, 0.0  ;;  %v1650_v25 = vadd.f32 (!%p2009_p12), %v2726_v58, %v1605_v13  ;;  %1719 = vst [vmem:[#allocation8] sm:$0xff] (!%p2009_p12), %v1681_v15  ;;  %v1621_v15 = vmul.f32 (!%p2009_p12), %v2721_v57, %v1576_v3 }
 0x201   : > { %1720 = vst [vmem:[#allocation8 + $0x8] sm:$0xff] (!%p2009_p12), %v1682_v22  ;;  %1721 = vst [vmem:[#allocation8 + $0x10] sm:$0xff] (!%p2009_p12), %v1683_v23  ;;  %v1579_v22 = vld [vmem:[#allocation2 + $0xd0] sm:$0xff] (!%p2009_p12)  ;;  %v1580_v23 = vld [vmem:[#allocation2 + $0xd8] sm:$0xff] (!%p2009_p12) }
 0x202   : > { %1544 = vst [vmem:[#allocation2 + $0x108] sm:$0xff] %v1506_v27  ;;  %v1566_v27 = vld [vmem:[#allocation2 + $0x68] sm:$0xff] (!%p2009_p12)  ;;  %1722 = vst [vmem:[#allocation8 + $0x18] sm:$0xff] (!%p2009_p12), %v1684_v24 }
 0x203   : > { %v1273_v28 = vpop.f32.mrb[68].mxu0  ;;  %v1458_v30 = vpop.f32.mrb[68].mxu1 }
 0x204   : > { %v1275_v31 = vpop.f32.mrb[69].mxu0  ;;  %v1459_v32 = vadd.f32 %v1458_v30, %v1273_v28  ;;  %v1460_v33 = vpop.f32.mrb[69].mxu1  ;;  %v1567_v28 = vld [vmem:[#allocation2 + $0x70] sm:$0xff] (!%p2009_p12)  ;;  %v1686_v30 = vmax.f32 (!%p2009_p12), %v1648_v17, 0.0 }
 0x205   : > { %v1276_v34 = vpop.f32.mrb[70].mxu0  ;;  %v1461_v36 = vpop.f32.mrb[70].mxu1  ;;  %v1687_v31 = vmax.f32 (!%p2009_p12), %v1649_v18, 0.0  ;;  %v1568_v33 = vld [vmem:[#allocation2 + $0x78] sm:$0xff] (!%p2009_p12)  ;;  %v1663_v18 = vadd.f32 (!%p2009_p12), %v2726_v58, %v1618_v9 }
 0x206   : > { %v1278_v37 = vpop.f32.mrb[71].mxu0  ;;  %v1507_v38 = vadd.f32 %v1459_v32, %v387_v29  ;;  %v1462_v39 = vadd.f32 %v1461_v36, %v1276_v34  ;;  %v1463_v40 = vpop.f32.mrb[71].mxu1  ;;  %v1685_v29 = vmax.f32 (!%p2009_p12), %v1647_v16, 0.0  ;;  %v1606_v32 = vmul.f32 (!%p2009_p12), %v2721_v57, %v1561_v14  ;;  %1724 = vst [vmem:[#allocation8 + $0x28] sm:$0xff] (!%p2009_p12), %v1686_v30  ;;  %v1577_v16 = vld [vmem:[#allocation2 + $0xc0] sm:$0xff] (!%p2009_p12)  ;;  %v1583_v30 = vld [vmem:[#allocation2 + $0xf0] sm:$0xff] (!%p2009_p12) }
 0x207   : > { %v1688_v34 = vmax.f32 (!%p2009_p12), %v1650_v25, 0.0  ;;  %v1608_v36 = vmul.f32 (!%p2009_p12), %v2721_v57, %v1563_v20  ;;  %v1609_v37 = vmul.f32 (!%p2009_p12), %v2721_v57, %v1564_v21  ;;  %1725 = vst [vmem:[#allocation8 + $0x30] sm:$0xff] (!%p2009_p12), %v1687_v31  ;;  %v1611_v40 = vmul.f32 (!%p2009_p12), %v2721_v57, %v1566_v27  ;;  %v1578_v21 = vld [vmem:[#allocation2 + $0xc8] sm:$0xff] (!%p2009_p12) }
 0x208   : > { %1545 = vst [vmem:[#allocation2 + $0x110] sm:$0xff] %v1507_v38  ;;  %v1508_v41 = vadd.f32 %v1462_v39, %v388_v35  ;;  %v1607_v35 = vmul.f32 (!%p2009_p12), %v2721_v57, %v1562_v19  ;;  %1723 = vst [vmem:[#allocation8 + $0x20] sm:$0xff] (!%p2009_p12), %v1685_v29  ;;  %v1651_v38 = vadd.f32 (!%p2009_p12), %v2726_v58, %v1606_v32  ;;  %v1582_v29 = vld [vmem:[#allocation2 + $0xe8] sm:$0xff] (!%p2009_p12)  ;;  %v1701_v31 = vmax.f32 (!%p2009_p12), %v1663_v18, 0.0 }
 0x209   : > { %v1610_v39 = vmul.f32 (!%p2009_p12), %v2721_v57, %v1565_v26  ;;  %1726 = vst [vmem:[#allocation8 + $0x38] sm:$0xff] (!%p2009_p12), %v1688_v34  ;;  %v1664_v19 = vadd.f32 (!%p2009_p12), %v2726_v58, %v1619_v10  ;;  %v1665_v20 = vadd.f32 (!%p2009_p12), %v2726_v58, %v1620_v11  ;;  %v1666_v27 = vadd.f32 (!%p2009_p12), %v2726_v58, %v1621_v15 }
 0x20a   : > { %1546 = vst [vmem:[#allocation2 + $0x118] sm:$0xff] %v1508_v41  ;;  %v1612_v41 = vmul.f32 (!%p2009_p12), %v2721_v57, %v1567_v28  ;;  %v1581_v28 = vld [vmem:[#allocation2 + $0xe0] sm:$0xff] (!%p2009_p12)  ;;  %v1622_v34 = vmul.f32 (!%p2009_p12), %v2721_v57, %v1577_v16  ;;  %1739 = vst [vmem:[#allocation8 + $0xa0] sm:$0xff] (!%p2009_p12), %v1701_v31 }
 0x20b   : > { %v1281_v42 = vpop.f32.mrb[72].mxu0  ;;  %v1466_v44 = vpop.f32.mrb[72].mxu1  ;;  %v1702_v32 = vmax.f32 (!%p2009_p12), %v1664_v19, 0.0 }
 0x20c   : > { %v1283_v45 = vpop.f32.mrb[73].mxu0  ;;  %v1467_v46 = vadd.f32 %v1466_v44, %v1281_v42  ;;  %v1468_v47 = vpop.f32.mrb[73].mxu1  ;;  %1552 = sbr.rel (%p2009_p12) target bundleno = 547 (0x223), region = 52  ;;  %v1652_v42 = vadd.f32 (!%p2009_p12), %v2726_v58, %v1607_v35  ;;  %v1654_v44 = vadd.f32 (!%p2009_p12), %v2726_v58, %v1609_v37  ;;  %v1584_v35 = vld [vmem:[#allocation2 + $0xf8] sm:$0xff] (!%p2009_p12)  ;;  %v1623_v37 = vmul.f32 (!%p2009_p12), %v2721_v57, %v1578_v21 }
 0x20d   : > { %v1284_v48 = vpop.f32.mrb[74].mxu0  ;;  %v1469_v50 = vpop.f32.mrb[74].mxu1  ;;  %v1613_v45 = vmul.f32 (!%p2009_p12), %v2721_v57, %v1568_v33  ;;  %v1689_v47 = vmax.f32 (!%p2009_p12), %v1651_v38, 0.0  ;;  %v1703_v33 = vmax.f32 (!%p2009_p12), %v1665_v20, 0.0  ;;  %v1624_v38 = vmul.f32 (!%p2009_p12), %v2721_v57, %v1579_v22  ;;  %1740 = vst [vmem:[#allocation8 + $0xa8] sm:$0xff] (!%p2009_p12), %v1702_v32 }
 0x20e   : > { %v1286_v51 = vpop.f32.mrb[75].mxu0  ;;  %v1509_v52 = vadd.f32 %v1467_v46, %v389_v43  ;;  %v1470_v53 = vadd.f32 %v1469_v50, %v1284_v48  ;;  %v1471_v54 = vpop.f32.mrb[75].mxu1  ;;  %v1653_v43 = vadd.f32 (!%p2009_p12), %v2726_v58, %v1608_v36  ;;  %v1569_v46 = vld [vmem:[#allocation2 + $0x80] sm:$0xff] (!%p2009_p12)  ;;  %v1655_v48 = vadd.f32 (!%p2009_p12), %v2726_v58, %v1610_v39 }
 0x20f   : > { %v1657_v50 = vadd.f32 (!%p2009_p12), %v2726_v58, %v1612_v41  ;;  %v1570_v51 = vld [vmem:[#allocation2 + $0x88] sm:$0xff] (!%p2009_p12)  ;;  %v1690_v54 = vmax.f32 (!%p2009_p12), %v1652_v42, 0.0  ;;  %v1692_v56 = vmax.f32 (!%p2009_p12), %v1654_v44, 0.0  ;;  %v1658_v59 = vadd.f32 (!%p2009_p12), %v2726_v58, %v1613_v45  ;;  %1727 = vst [vmem:[#allocation8 + $0x40] sm:$0xff] (!%p2009_p12), %v1689_v47  ;;  %1741 = vst [vmem:[#allocation8 + $0xb0] sm:$0xff] (!%p2009_p12), %v1703_v33 }
 0x210   : > { %1547 = vst [vmem:[#allocation2 + $0x120] sm:$0xff] %v1509_v52  ;;  %v1510_v55 = vadd.f32 %v1470_v53, %v390_v49  ;;  %v1656_v49 = vadd.f32 (!%p2009_p12), %v2726_v58, %v1611_v40  ;;  %v1571_v52 = vld [vmem:[#allocation2 + $0x90] sm:$0xff] (!%p2009_p12)  ;;  %v1572_v53 = vld [vmem:[#allocation2 + $0x98] sm:$0xff] (!%p2009_p12)  ;;  %v1693_v63 = vmax.f32 (!%p2009_p12), %v1655_v48, 0.0  ;;  %v1614_v2 = vmul.f32 (!%p2009_p12), %v2721_v57, %v1569_v46  ;;  %v1585_v48 = vld [vmem:[#allocation2 + $0x100] sm:$0xff] (!%p2009_p12) }
 0x211   : > { %v1695_v1 = vmax.f32 (!%p2009_p12), %v1657_v50, 0.0  ;;  %1728 = vst [vmem:[#allocation8 + $0x48] sm:$0xff] (!%p2009_p12), %v1690_v54  ;;  %1730 = vst [vmem:[#allocation8 + $0x58] sm:$0xff] (!%p2009_p12), %v1692_v56  ;;  %v1696_v4 = vmax.f32 (!%p2009_p12), %v1658_v59, 0.0  ;;  %v1615_v5 = vmul.f32 (!%p2009_p12), %v2721_v57, %v1570_v51  ;;  %v1616_v6 = vmul.f32 (!%p2009_p12), %v2721_v57, %v1571_v52  ;;  %v1587_v54 = vld [vmem:[#allocation2 + $0x110] sm:$0xff] (!%p2009_p12) }
 0x212   : > { %1548 = vst [vmem:[#allocation2 + $0x128] sm:$0xff] %v1510_v55  ;;  %v1691_v55 = vmax.f32 (!%p2009_p12), %v1653_v43, 0.0  ;;  %v1694_v0 = vmax.f32 (!%p2009_p12), %v1656_v49, 0.0  ;;  %v1617_v7 = vmul.f32 (!%p2009_p12), %v2721_v57, %v1572_v53  ;;  %1731 = vst [vmem:[#allocation8 + $0x60] sm:$0xff] (!%p2009_p12), %v1693_v63  ;;  %v1659_v8 = vadd.f32 (!%p2009_p12), %v2726_v58, %v1614_v2  ;;  %v1586_v53 = vld [vmem:[#allocation2 + $0x108] sm:$0xff] (!%p2009_p12) }
 0x213   : > { %1733 = vst [vmem:[#allocation8 + $0x70] sm:$0xff] %v1695_v1  ;;  %1734 = vst [vmem:[#allocation8 + $0x78] sm:$0xff] %v1696_v4  ;;  %v1660_v12 = vadd.f32 %v2726_v58, %v1615_v5  ;;  %v1661_v13 = vadd.f32 %v2726_v58, %v1616_v6  ;;  %v1704_v36 = vmax.f32 %v1666_v27, 0.0  ;;  %v1625_v39 = vmul.f32 %v2721_v57, %v1580_v23 }
 0x214   : > { %1729 = vst [vmem:[#allocation8 + $0x50] sm:$0xff] %v1691_v55  ;;  %1732 = vst [vmem:[#allocation8 + $0x68] sm:$0xff] %v1694_v0  ;;  %v1662_v14 = vadd.f32 %v2726_v58, %v1617_v7  ;;  %v1697_v17 = vmax.f32 %v1659_v8, 0.0  ;;  %v1667_v40 = vadd.f32 %v2726_v58, %v1622_v34  ;;  %v1626_v41 = vmul.f32 %v2721_v57, %v1581_v28  ;;  %v1588_v55 = vld [vmem:[#allocation2 + $0x118] sm:$0xff] }
 0x215   : > { %v1698_v24 = vmax.f32 %v1660_v12, 0.0  ;;  %v1699_v25 = vmax.f32 %v1661_v13, 0.0  ;;  %v1627_v42 = vmul.f32 %v2721_v57, %v1582_v29  ;;  %v1628_v43 = vmul.f32 %v2721_v57, %v1583_v30  ;;  %1742 = vst [vmem:[#allocation8 + $0xb8] sm:$0xff] %v1704_v36 }
 0x216   : > { %v1700_v26 = vmax.f32 %v1662_v14, 0.0  ;;  %1735 = vst [vmem:[#allocation8 + $0x80] sm:$0xff] %v1697_v17  ;;  %v1668_v44 = vadd.f32 %v2726_v58, %v1623_v37  ;;  %v1669_v45 = vadd.f32 %v2726_v58, %v1624_v38  ;;  %v1670_v46 = vadd.f32 %v2726_v58, %v1625_v39 }
 0x217   : > { %1736 = vst [vmem:[#allocation8 + $0x88] sm:$0xff] %v1698_v24  ;;  %1737 = vst [vmem:[#allocation8 + $0x90] sm:$0xff] %v1699_v25  ;;  %v1629_v47 = vmul.f32 %v2721_v57, %v1584_v35  ;;  %v1705_v49 = vmax.f32 %v1667_v40, 0.0  ;;  %v1671_v50 = vadd.f32 %v2726_v58, %v1626_v41  ;;  %v1672_v51 = vadd.f32 %v2726_v58, %v1627_v42  ;;  %v1589_v62 = vld [vmem:[#allocation2 + $0x120] sm:$0xff] }
 0x218   : > { %1738 = vst [vmem:[#allocation8 + $0x98] sm:$0xff] %v1700_v26  ;;  %v1673_v52 = vadd.f32 %v2726_v58, %v1628_v43  ;;  %v1706_v56 = vmax.f32 %v1668_v44, 0.0  ;;  %v1707_v59 = vmax.f32 %v1669_v45, 0.0  ;;  %v1708_v60 = vmax.f32 %v1670_v46, 0.0 }
 0x219   : > { %v1674_v61 = vadd.f32 %v2726_v58, %v1629_v47  ;;  %v1590_v63 = vld [vmem:[#allocation2 + $0x128] sm:$0xff]  ;;  %1743 = vst [vmem:[#allocation8 + $0xc0] sm:$0xff] %v1705_v49  ;;  %v1709_v0 = vmax.f32 %v1671_v50, 0.0  ;;  %v1710_v1 = vmax.f32 %v1672_v51, 0.0  ;;  %v1630_v3 = vmul.f32 %v2721_v57, %v1585_v48 }
 0x21a   : > { %v1711_v2 = vmax.f32 %v1673_v52, 0.0  ;;  %1744 = vst [vmem:[#allocation8 + $0xc8] sm:$0xff] %v1706_v56  ;;  %1745 = vst [vmem:[#allocation8 + $0xd0] sm:$0xff] %v1707_v59  ;;  %v1631_v5 = vmul.f32 %v2721_v57, %v1586_v53  ;;  %v1632_v6 = vmul.f32 %v2721_v57, %v1587_v54  ;;  %v1633_v7 = vmul.f32 %v2721_v57, %v1588_v55 }
 0x21b   : > { %1746 = vst [vmem:[#allocation8 + $0xd8] sm:$0xff] %v1708_v60  ;;  %v1712_v4 = vmax.f32 %v1674_v61, 0.0  ;;  %1747 = vst [vmem:[#allocation8 + $0xe0] sm:$0xff] %v1709_v0  ;;  %v1675_v8 = vadd.f32 %v2726_v58, %v1630_v3  ;;  %v1634_v9 = vmul.f32 %v2721_v57, %v1589_v62  ;;  %v1635_v10 = vmul.f32 %v2721_v57, %v1590_v63 }
 0x21c   : > { %1748 = vst [vmem:[#allocation8 + $0xe8] sm:$0xff] %v1710_v1  ;;  %1749 = vst [vmem:[#allocation8 + $0xf0] sm:$0xff] %v1711_v2  ;;  %v1676_v11 = vadd.f32 %v2726_v58, %v1631_v5  ;;  %v1677_v12 = vadd.f32 %v2726_v58, %v1632_v6  ;;  %v1678_v13 = vadd.f32 %v2726_v58, %v1633_v7 }
 0x21d   : > { %1750 = vst [vmem:[#allocation8 + $0xf8] sm:$0xff] %v1712_v4  ;;  %v1713_v14 = vmax.f32 %v1675_v8, 0.0  ;;  %v1679_v15 = vadd.f32 %v2726_v58, %v1634_v9  ;;  %v1680_v16 = vadd.f32 %v2726_v58, %v1635_v10 }
 0x21e   : > { %v1714_v17 = vmax.f32 %v1676_v11, 0.0  ;;  %v1715_v18 = vmax.f32 %v1677_v12, 0.0  ;;  %v1716_v19 = vmax.f32 %v1678_v13, 0.0 }
 0x21f   : > { %1751 = vst [vmem:[#allocation8 + $0x100] sm:$0xff] %v1713_v14  ;;  %v1717_v20 = vmax.f32 %v1679_v15, 0.0  ;;  %v1718_v21 = vmax.f32 %v1680_v16, 0.0 }
 0x220   : > { %1752 = vst [vmem:[#allocation8 + $0x108] sm:$0xff] %v1714_v17  ;;  %1753 = vst [vmem:[#allocation8 + $0x110] sm:$0xff] %v1715_v18 }
 0x221   : > { %1754 = vst [vmem:[#allocation8 + $0x118] sm:$0xff] %v1716_v19  ;;  %1755 = vst [vmem:[#allocation8 + $0x120] sm:$0xff] %v1717_v20 }
 0x222   : > { %1756 = vst [vmem:[#allocation8 + $0x128] sm:$0xff] %v1718_v21 }
 0x223 PF: > { %p2806_p4 = scmp.eq.s32.totalorder %s1888_s21, 2  ;;  %s2397_s6 = smov [#allocation8]  }
 0x224   : > { %s1767_s12 = sshll.u32 %s2397_s6, 4  ;;  %s1768_s12 = int_to_ptr.vmem [resolvable:$true] %s1767_s12 }
 0x225   : > { %s2302_s13 = scalar_lea.vmem %s1768_s12, 4864  ;;  %p2309_p0 = scmp.lt.s32.totalorder %s1768_s12, %s1768_s12 }
 0x226   : > { %p2303_p8 = scmp.ne.s32.totalorder %s1768_s12, %s2302_s13  ;;  %p2310_p10 = scmp.lt.s32.totalorder %s2302_s13, %s2302_s13 }
 0x228   : > { %p2304_p2 = pnand %p2303_p8, %p2806_p4  ;;  %p2311_p5 = por %p2310_p10, %p2309_p0 }
 0x22a   : > { %p2305_p3 = pneg %p2304_p2 }
 0x22c   : > { %p2312_p6 = pnand %p2311_p5, %p2305_p3 }
 0x22e   : > { %2315 = shalt.err (!%p2312_p6)
}
 0x22f   : > { %s2316_s21 = scalar_lea.hbm %s2854_s4, 4864 }
 0x230   : > { %p2317_p11 = scmp.ne.s32.totalorder %s2854_s4, %s2316_s21  ;;  %p2322_p7 = scmp.lt.u32.totalorder %s2316_s21, %s2854_s4 }
 0x232   : > { %p2318_p13 = pnand %p2317_p11, %p2806_p4 }
 0x234   : > { %p2319_p1 = pneg %p2318_p13 }
 0x236   : > { %p2324_p9 = pnand %p2322_p7, %p2319_p1 }
 0x238   : > { %2327 = shalt.err (!%p2324_p9)
}
 0x239   : > { %s2398_s5 = smov 128   ;;  %s2399_s8 = smov 8  }
 0x23a   : > { %2025 = dma.vmem_to_hbm [thread:$0]  (%p2806_p4), %s1768_s12, 4864, %s2854_s4, [#allocation5], %s2398_s5, %s2398_s5, %s2399_s8  }
 0x23b   : > { %2361 = dma.done.wait (%p2806_p4), [#allocation5], 4864  }
 0x23c   : > { %2363 = vsyncadd (%p2806_p4), [#allocation5], 4294962432 }
 0x23d PF: > { %s21_s20 = sadd.s32 1, %s2386_s20   ;;  %s2862_s15 = smov %s2370_s16 }
 0x23e   : > { %p18_p12 = scmp.ge.s32.totalorder %s21_s20, 5   ;;  %s2863_s16 = smov %s2374_s17 }
 0x23f   : > { %s2864_s17 = smov %s2472_s26  ;;  %s2865_s18 = smov %s2382_s19 }
 0x240   : > { %s2866_s19 = smov %s2868_s22  ;;  %20 = sbr.rel (!%p18_p12) target bundleno = 7 (0x7), region = 101 }
 0x247   :  { %1783 = vsyncpa [#allocation4], 1 }
 0x248   :  { %1785 = vsyncpa [#allocation4 + $0x1], 1 }
 0x249   :  { %1786 = vsyncpa [#allocation7], 1 }
 0x24a   :  { %1788 = vsyncpa [#allocation7 + $0x1], 1 }
 0x24b   :  { %1789 = vsyncpa [#allocation5], 1 }
 0x24c   :  { %1791 = vsyncpa [#allocation5 + $0x1], 1 }

</bundles_post_ra>
